<compile_context>
chip_gen: v7x
topology: tpu7x:2x2x1
jax: 0.10.0
libtpu: 0.0.40
codegen_flags: <defaults>
</compile_context>

<pallas_src>
import jax
import jax.numpy as jnp
from jax.experimental import pallas as pl
from jax.experimental.pallas import tpu as pltpu

DIM = 32      # hidden dim ("dim" global in the PyTorch module)
LANES = 128   # full vreg lane width carried by the fused activation

# Row indices inside the packed per-candidate parameter tensor [NROWS, 128].
ROW_W0, ROW_B0, ROW_CB, ROW_GAMMA, ROW_BETA, ROW_BLIN1, ROW_W2 = 0, 1, 2, 5, 6, 7, 8
NROWS = 9


def nas_gnn_kernel(x_ref, a2_ref, p_ref, wconv_ref, wlin1_ref, rows_ref, out_ref):
    f32, bf16 = jnp.float32, jnp.bfloat16
    cpb, n = x_ref.shape[0], x_ref.shape[1]          # candidates per block, nodes
    lanes = rows_ref.shape[2]                        # 128
    bsz = p_ref.shape[1]                             # graphs per candidate
    inv_n = 1.0 / n

    # Hoisted lane mask: lanes 0:96 read the 'add'-aggregated rows, 96:128 the 'mean' rows.
    lane = jax.lax.broadcasted_iota(jnp.int32, (n, lanes), 1)
    sel_add = lane < 96

    outs = []
    for c in range(cpb):                             # static, unrolled candidate loop
        def row(r, _c=c):
            return rows_ref[_c, r:r + 1, :]          # [1,128] f32, free static slice

        # lin0 + ReLU as a VPU broadcast multiply (K=1 contraction; no MXU matmul).
        # w0/b0 are zero on lanes >= 64, so h = [branch0 | branch1 | zeros].
        h = jnp.maximum(x_ref[c] * row(ROW_W0) + row(ROW_B0), 0.0)          # [N,128] f32
        a2 = a2_ref[c]                                                      # [2N,N] bf16
        gam, bet = row(ROW_GAMMA), row(ROW_BETA)

        for l in range(3):
            # One block-diagonal weight matmul for both branches (root -> lanes 0:64,
            # neighbor-transformed features -> lanes 64:128).  bf16 operands, f32 acc.
            rs = jnp.dot(h.astype(bf16), wconv_ref[c, l],
                         preferred_element_type=f32)                        # [N,128]
            # One adjacency matmul for both aggregations (rows 0:N='add', N:2N='mean').
            m = jnp.dot(a2, rs.astype(bf16), preferred_element_type=f32)    # [2N,128]
            mixed = jnp.where(sel_add, m[:n, :], m[n:, :])
            msg = pltpu.roll(mixed, shift=64, axis=1)                       # nbr msgs -> 0:64
            hh = jnp.maximum(rs + msg + row(ROW_CB + l), 0.0)               # conv act = ReLU
            # BatchNorm1d (training-mode stats), fused single pass, kept in f32.
            s1 = jnp.sum(hh, axis=0, keepdims=True)                         # [1,128]
            s2 = jnp.sum(hh * hh, axis=0, keepdims=True)                    # [1,128]
            mu = s1 * inv_n
            var = jnp.maximum(s2 * inv_n - mu * mu, 0.0)
            # gamma is zero-padded on lanes 64:128 -> scratch lanes of h come out exactly 0
            # (replaces the old per-layer where() mask at zero cost).
            h = (hh - mu) * jax.lax.rsqrt(var + 1e-5) * gam + bet           # [N,128]

        # global_mean_pool for both branches in one matmul, then lin1/lin12 + ReLU
        # (block-diagonal weights).
        pooled = jnp.dot(p_ref[c], h.astype(bf16), preferred_element_type=f32)   # [B,128]
        o = jnp.maximum(jnp.dot(pooled.astype(bf16), wlin1_ref[c],
                                preferred_element_type=f32) + row(ROW_BLIN1), 0.0)
        # aggr_type == 'sum': lin2(out1 + out2) as a VPU multiply + XLU lane reduce
        # (no transpose).  Lane 64 of o is 1 by construction and w2[64] = b2.
        outs.append(jnp.sum(o * row(ROW_W2), axis=1, keepdims=True))        # [B,1]

    out_ref[...] = jnp.concatenate(outs, axis=0)                            # [cpb*B, 1]


def nas_gnn_forward(x, a_add, a_mean, pool, params, *, candidates_per_block=2):
    """x:[C,N,1]  a_add/a_mean:[C,N,N]  pool:[C,B,N]  params: per-candidate module params."""
    (w0, b0, wroot, wnbr, cbias, gamma, beta, wlin1, blin1, w2, b2) = params
    f32, bf16 = jnp.float32, jnp.bfloat16
    C, N, _ = x.shape
    B = pool.shape[1]
    D = w0.shape[-1]
    L = 2 * D              # both branches side by side on the lane axis
    LN = LANES
    cpb = candidates_per_block
    assert C % cpb == 0, "candidate count must be a multiple of candidates_per_block"
    G = C // cpb           # grid length (keep >= 2 so v7x uses both TensorCores)

    def zpad(t, width=LN):
        pad = jnp.zeros(t.shape[:-1] + (width - t.shape[-1],), f32)
        return jnp.concatenate([t, pad], axis=-1)

    # --- packed per-candidate row parameters: ONE [NROWS,128] DMA instead of eight ---
    w0row = zpad(jnp.concatenate([w0[:, 0], w0[:, 0]], axis=-1))             # [C,128]
    b0row = zpad(jnp.concatenate([b0[:, 0], b0[:, 0]], axis=-1))
    cbrows = zpad(jnp.concatenate([cbias[:, 0], cbias[:, 1]], axis=-1))      # [C,3,128]
    # gamma/beta ZERO-padded past lane 2D: BatchNorm zeroes the scratch lanes for free.
    gmrow = zpad(jnp.concatenate([gamma[:, 0], gamma[:, 1]], axis=-1))
    btrow = zpad(jnp.concatenate([beta[:, 0], beta[:, 1]], axis=-1))
    bl1row = zpad(jnp.concatenate([blin1[:, 0], blin1[:, 1]], axis=-1))
    w2row = zpad(jnp.concatenate([w2[..., 0], w2[..., 0]], axis=-1))
    # lin2-bias fold: wlin1 column 2D is zero, blin1[2D]=1 -> o[:,2D]==1; w2[2D]=b2.
    bl1row = bl1row.at[:, L].set(1.0)
    w2row = w2row.at[:, L].set(b2[:, 0, 0])
    rows = jnp.stack([w0row, b0row, cbrows[:, 0], cbrows[:, 1], cbrows[:, 2],
                      gmrow, btrow, bl1row, w2row], axis=1)                  # [C,NROWS,128]

    # Per-layer fused conv weight [128,128] (bf16):
    #   rows 0:32 -> (wr0 | .  | wn0 | . ), rows 32:64 -> ( . | wr1 | .  | wn1), rows 64:128 = 0
    wconv = jnp.zeros((C, 3, LN, LN), f32)
    wconv = wconv.at[:, :, 0:D, 0:D].set(wroot[:, 0])
    wconv = wconv.at[:, :, D:L, D:L].set(wroot[:, 1])
    wconv = wconv.at[:, :, 0:D, L:L + D].set(wnbr[:, 0])
    wconv = wconv.at[:, :, D:L, L + D:2 * L].set(wnbr[:, 1])
    wconv = wconv.astype(bf16)

    wlin1p = jnp.zeros((C, LN, LN), f32)
    wlin1p = wlin1p.at[:, 0:D, 0:D].set(wlin1[:, 0])
    wlin1p = wlin1p.at[:, D:L, D:L].set(wlin1[:, 1])
    wlin1p = wlin1p.astype(bf16)

    # Stacked adjacency: rows 0:N = 'add' aggregation, rows N:2N = 'mean' aggregation.
    a2 = jnp.concatenate([a_add, a_mean], axis=1).astype(bf16)               # [C,2N,N]
    poolb = pool.astype(bf16)

    in_specs = [
        pl.BlockSpec((cpb, N, 1), lambda g: (g, 0, 0)),          # x        (f32)
        pl.BlockSpec((cpb, 2 * N, N), lambda g: (g, 0, 0)),      # adjacency (bf16)
        pl.BlockSpec((cpb, B, N), lambda g: (g, 0, 0)),          # pooling   (bf16)
        pl.BlockSpec((cpb, 3, LN, LN), lambda g: (g, 0, 0, 0)),  # conv weights (bf16)
        pl.BlockSpec((cpb, LN, LN), lambda g: (g, 0, 0)),        # lin1 weights (bf16)
        pl.BlockSpec((cpb, NROWS, LN), lambda g: (g, 0, 0)),     # packed row params (f32)
    ]
    out_specs = pl.BlockSpec((None, cpb * B, 1), lambda g: (g, 0, 0))

    # VMEM sizing: raise the scoped limit only when the per-step block is pushed big
    # (relevant on v5e whose scoped default is 16 MiB; v6e/v7x defaults are 32 MiB).
    per_cand = (N * 4 + 2 * N * N * 2 + B * N * 2
                + 3 * LN * LN * 2 + LN * LN * 2 + NROWS * LN * 4)
    vmem_est = 2 * cpb * per_cand + 2 * cpb * B * 4              # double-buffered in+out
    cparams = {"dimension_semantics": ("parallel",)}
    if vmem_est > 12 * (1 << 20):
        cparams["vmem_limit_bytes"] = int(min(2 * vmem_est, 96 * (1 << 20)))

    out = pl.pallas_call(
        nas_gnn_kernel,
        out_shape=jax.ShapeDtypeStruct((G, cpb * B, 1), f32),
        grid=(G,),
        in_specs=in_specs,
        out_specs=out_specs,
        compiler_params=pltpu.CompilerParams(**cparams),
    )(x, a2, poolb, wconv, wlin1p, rows)
    return out.reshape(C, B)   # per-candidate .view(-1)


def nas_gnn_reference(x, a_add, a_mean, pool, params):
    """Pure-JAX (f32) per-candidate reference matching the PyTorch forward semantics."""
    (w0, b0, wroot, wnbr, cbias, gamma, beta, wlin1, blin1, w2, b2) = params
    h0 = jax.nn.relu(x @ w0 + b0)

    def branch(b, adj):
        h = h0
        for l in range(3):
            h = h @ wroot[b, l] + adj @ (h @ wnbr[b, l]) + cbias[b, l]
            h = jax.nn.relu(h)
            mu = h.mean(0, keepdims=True)
            var = ((h - mu) ** 2).mean(0, keepdims=True)
            h = (h - mu) / jnp.sqrt(var + 1e-5) * gamma[b] + beta[b]
        pooled = pool @ h
        return jax.nn.relu(pooled @ wlin1[b] + blin1[b])

    out = branch(0, a_add) + branch(1, a_mean)
    return (out @ w2 + b2).reshape(-1)


if __name__ == "__main__":
    key = jax.random.PRNGKey(0)
    C = 4                         # NAS candidates / graphs evaluated in one gridded call
    N, B, E, D = 16, 2, 40, DIM   # 16 nodes, 2 graphs (8 nodes each), 40 edges

    kg = jax.random.split(key, 16)

    # --- graph construction per candidate (glue) ---
    g = jax.random.randint(kg[0], (C, E), 0, B)
    src = jax.random.randint(kg[1], (C, E), 0, N // B) + (N // B) * g
    dst = jax.random.randint(kg[2], (C, E), 0, N // B) + (N // B) * g
    edge_attr = jax.random.uniform(kg[3], (C, E), minval=0.5, maxval=1.5)

    def build_adj(src_c, dst_c, ea_c):
        a_add_c = jnp.zeros((N, N), jnp.float32).at[dst_c, src_c].add(ea_c)      # 'add' aggr
        in_deg = jnp.zeros((N,), jnp.float32).at[dst_c].add(1.0)
        a_mean_c = a_add_c / jnp.clip(in_deg[:, None], 1.0, None)                # 'mean' aggr
        return a_add_c, a_mean_c

    a_add, a_mean = jax.vmap(build_adj)(src, dst, edge_attr)                     # [C,N,N] each

    batch = jnp.repeat(jnp.arange(B), N // B)
    pool1 = jax.nn.one_hot(batch, B, dtype=jnp.float32).T                        # [B,N]
    pool1 = pool1 / pool1.sum(axis=1, keepdims=True)                             # global_mean_pool
    pool = jnp.tile(pool1[None], (C, 1, 1))                                      # [C,B,N]

    x = jax.random.normal(kg[4], (C, N, 1), jnp.float32)                         # data.x

    # --- deterministic per-candidate parameter init (shapes from the module __init__) ---
    s = 0.1
    w0 = s * jax.random.normal(kg[5], (C, 1, D), jnp.float32)       # lin0
    b0 = s * jax.random.normal(kg[6], (C, 1, D), jnp.float32)
    wroot = s * jax.random.normal(kg[7], (C, 2, 3, D, D), jnp.float32)   # conv1..6 root
    wnbr = s * jax.random.normal(kg[8], (C, 2, 3, D, D), jnp.float32)    # conv1..6 neighbor
    cbias = s * jax.random.normal(kg[9], (C, 2, 3, D), jnp.float32)      # conv biases
    gamma = jnp.ones((C, 2, D), jnp.float32)                             # norm / norm2
    beta = jnp.zeros((C, 2, D), jnp.float32)
    wlin1 = s * jax.random.normal(kg[10], (C, 2, D, D), jnp.float32)     # lin1 / lin12
    blin1 = s * jax.random.normal(kg[11], (C, 2, D), jnp.float32)
    w2 = s * jax.random.normal(kg[12], (C, D, 1), jnp.float32)           # lin2 (aggr_type='sum')
    b2 = s * jax.random.normal(kg[13], (C, 1, 1), jnp.float32)
    # TODO(synk): lin3 (dim*2 -> 1) only used when aggr_type != 'sum'; not exercised here.

    params = (w0, b0, wroot, wnbr, cbias, gamma, beta, wlin1, blin1, w2, b2)

    out = nas_gnn_forward(x, a_add, a_mean, pool, params, candidates_per_block=2)   # [C, B]
    out = jax.block_until_ready(out)

    for c in range(C):
        pc = tuple(p[c] for p in params)
        ref = nas_gnn_reference(x[c], a_add[c], a_mean[c], pool[c], pc)
        assert out[c].shape == (B,)
        # Tolerance accounts for bf16 MXU operands (f32 accumulation, f32 BN stats) vs
        # the pure-f32 reference; expected error is ~1-3% relative.
        assert jnp.allclose(out[c], ref, rtol=6e-2, atol=3e-2), (c, out[c], ref)

    print("KERNEL_OK")
</pallas_src>

<mosaic_0001>
module attributes {stable_mosaic.version = 11 : i64} {
  func.func @nas_gnn_kernel(%arg0: i32, %arg1: memref<2x16x1xf32, #tpu.memory_space<vmem>>, %arg2: memref<2x32x16xbf16, #tpu.memory_space<vmem>>, %arg3: memref<2x2x16xbf16, #tpu.memory_space<vmem>>, %arg4: memref<2x3x128x128xbf16, #tpu.memory_space<vmem>>, %arg5: memref<2x128x128xbf16, #tpu.memory_space<vmem>>, %arg6: memref<2x9x128xf32, #tpu.memory_space<vmem>>, %arg7: memref<1x4x1xf32, #tpu.memory_space<vmem>>) attributes {dimension_semantics = [#tpu.dimension_semantics<parallel>], iteration_bounds = array<i64: 2>, scalar_prefetch = 0 : i64, scratch_operands = 0 : i64, tpu.core_type = #tpu.core_type<tc>, window_params = [{transform_indices = @transform_0, window_bounds = array<i64: 2, 16, 1>}, {transform_indices = @transform_1, window_bounds = array<i64: 2, 32, 16>}, {transform_indices = @transform_2, window_bounds = array<i64: 2, 2, 16>}, {transform_indices = @transform_3, window_bounds = array<i64: 2, 3, 128, 128>}, {transform_indices = @transform_4, window_bounds = array<i64: 2, 128, 128>}, {transform_indices = @transform_5, window_bounds = array<i64: 2, 9, 128>}, {transform_indices = @transform_6, window_bounds = array<i64: 1, 4, 1>}]} {
    %0 = tpu.iota {dimensions = array<i32: 1>} : vector<16x128xi32>
    %c96_i32 = arith.constant 96 : i32
    %1 = vector.broadcast %c96_i32 : i32 to vector<16x128xi32>
    %2 = arith.cmpi slt, %0, %1 : vector<16x128xi32>
    %c0 = arith.constant 0 : index
    %c0_0 = arith.constant 0 : index
    %c0_1 = arith.constant 0 : index
    %3 = vector.load %arg1[%c0, %c0_0, %c0_1] : memref<2x16x1xf32, #tpu.memory_space<vmem>>, vector<1x16x1xf32>
    %4 = vector.shape_cast %3 : vector<1x16x1xf32> to vector<16x1xf32>
    %c0_2 = arith.constant 0 : index
    %c0_3 = arith.constant 0 : index
    %c0_4 = arith.constant 0 : index
    %5 = vector.load %arg6[%c0_2, %c0_3, %c0_4] : memref<2x9x128xf32, #tpu.memory_space<vmem>>, vector<1x1x128xf32>
    %6 = vector.shape_cast %5 : vector<1x1x128xf32> to vector<1x128xf32>
    %7 = vector.broadcast %4 : vector<16x1xf32> to vector<16x128xf32>
    %8 = vector.broadcast %6 : vector<1x128xf32> to vector<16x128xf32>
    %9 = arith.mulf %7, %8 : vector<16x128xf32>
    %c0_5 = arith.constant 0 : index
    %c1 = arith.constant 1 : index
    %c0_6 = arith.constant 0 : index
    %10 = vector.load %arg6[%c0_5, %c1, %c0_6] : memref<2x9x128xf32, #tpu.memory_space<vmem>>, vector<1x1x128xf32>
    %11 = vector.shape_cast %10 : vector<1x1x128xf32> to vector<1x128xf32>
    %12 = vector.broadcast %11 : vector<1x128xf32> to vector<16x128xf32>
    %13 = arith.addf %9, %12 : vector<16x128xf32>
    %cst = arith.constant 0.000000e+00 : f32
    %14 = vector.broadcast %cst : f32 to vector<16x128xf32>
    %15 = arith.maximumf %13, %14 : vector<16x128xf32>
    %c0_7 = arith.constant 0 : index
    %c0_8 = arith.constant 0 : index
    %c0_9 = arith.constant 0 : index
    %16 = vector.load %arg2[%c0_7, %c0_8, %c0_9] : memref<2x32x16xbf16, #tpu.memory_space<vmem>>, vector<1x32x16xbf16>
    %17 = vector.shape_cast %16 : vector<1x32x16xbf16> to vector<32x16xbf16>
    %c0_10 = arith.constant 0 : index
    %c5 = arith.constant 5 : index
    %c0_11 = arith.constant 0 : index
    %18 = vector.load %arg6[%c0_10, %c5, %c0_11] : memref<2x9x128xf32, #tpu.memory_space<vmem>>, vector<1x1x128xf32>
    %19 = vector.shape_cast %18 : vector<1x1x128xf32> to vector<1x128xf32>
    %c0_12 = arith.constant 0 : index
    %c6 = arith.constant 6 : index
    %c0_13 = arith.constant 0 : index
    %20 = vector.load %arg6[%c0_12, %c6, %c0_13] : memref<2x9x128xf32, #tpu.memory_space<vmem>>, vector<1x1x128xf32>
    %21 = vector.shape_cast %20 : vector<1x1x128xf32> to vector<1x128xf32>
    %22 = arith.truncf %15 : vector<16x128xf32> to vector<16x128xbf16>
    %c0_14 = arith.constant 0 : index
    %c0_15 = arith.constant 0 : index
    %c0_16 = arith.constant 0 : index
    %c0_17 = arith.constant 0 : index
    %23 = vector.load %arg4[%c0_14, %c0_15, %c0_16, %c0_17] : memref<2x3x128x128xbf16, #tpu.memory_space<vmem>>, vector<1x1x128x128xbf16>
    %24 = vector.shape_cast %23 : vector<1x1x128x128xbf16> to vector<128x128xbf16>
    %cst_18 = arith.constant dense<0.000000e+00> : vector<16x128xf32>
    %25 = tpu.matmul %22, %24, %cst_18 {dimension_numbers = #tpu.dot_dimension_numbers<[1], [0], [0], [1], [0, 0, 1, 1], [], []>} : vector<16x128xbf16>, vector<128x128xbf16>, vector<16x128xf32> -> vector<16x128xf32>
    %26 = arith.truncf %25 : vector<16x128xf32> to vector<16x128xbf16>
    %cst_19 = arith.constant dense<0.000000e+00> : vector<32x128xf32>
    %27 = tpu.matmul %17, %26, %cst_19 {dimension_numbers = #tpu.dot_dimension_numbers<[1], [0], [0], [1], [0, 0, 1, 1], [], []>} : vector<32x16xbf16>, vector<16x128xbf16>, vector<32x128xf32> -> vector<32x128xf32>
    %28 = vector.extract_strided_slice %27 {offsets = [0, 0], sizes = [16, 128], strides = [1, 1]} : vector<32x128xf32> to vector<16x128xf32>
    %29 = vector.extract_strided_slice %27 {offsets = [16, 0], sizes = [16, 128], strides = [1, 1]} : vector<32x128xf32> to vector<16x128xf32>
    %30 = arith.select %2, %28, %29 : vector<16x128xi1>, vector<16x128xf32>
    %c64_i32 = arith.constant 64 : i32
    %31 = tpu.dynamic_rotate %30 by %c64_i32 dim 1 : vector<16x128xf32>, i32 -> vector<16x128xf32>
    %32 = arith.addf %25, %31 : vector<16x128xf32>
    %c0_20 = arith.constant 0 : index
    %c2 = arith.constant 2 : index
    %c0_21 = arith.constant 0 : index
    %33 = vector.load %arg6[%c0_20, %c2, %c0_21] : memref<2x9x128xf32, #tpu.memory_space<vmem>>, vector<1x1x128xf32>
    %34 = vector.shape_cast %33 : vector<1x1x128xf32> to vector<1x128xf32>
    %35 = vector.broadcast %34 : vector<1x128xf32> to vector<16x128xf32>
    %36 = arith.addf %32, %35 : vector<16x128xf32>
    %cst_22 = arith.constant 0.000000e+00 : f32
    %37 = vector.broadcast %cst_22 : f32 to vector<16x128xf32>
    %38 = arith.maximumf %36, %37 : vector<16x128xf32>
    %cst_23 = arith.constant dense<0.000000e+00> : vector<128xf32>
    %39 = vector.multi_reduction <add>, %38, %cst_23 [0] : vector<16x128xf32> to vector<128xf32>
    %40 = vector.shape_cast %39 : vector<128xf32> to vector<1x128xf32>
    %41 = arith.mulf %38, %38 : vector<16x128xf32>
    %cst_24 = arith.constant dense<0.000000e+00> : vector<128xf32>
    %42 = vector.multi_reduction <add>, %41, %cst_24 [0] : vector<16x128xf32> to vector<128xf32>
    %43 = vector.shape_cast %42 : vector<128xf32> to vector<1x128xf32>
    %cst_25 = arith.constant 6.250000e-02 : f32
    %44 = vector.broadcast %cst_25 : f32 to vector<1x128xf32>
    %45 = arith.mulf %40, %44 : vector<1x128xf32>
    %cst_26 = arith.constant 6.250000e-02 : f32
    %46 = vector.broadcast %cst_26 : f32 to vector<1x128xf32>
    %47 = arith.mulf %43, %46 : vector<1x128xf32>
    %48 = arith.mulf %45, %45 : vector<1x128xf32>
    %49 = arith.subf %47, %48 : vector<1x128xf32>
    %cst_27 = arith.constant 0.000000e+00 : f32
    %50 = vector.broadcast %cst_27 : f32 to vector<1x128xf32>
    %51 = arith.maximumf %49, %50 : vector<1x128xf32>
    %52 = vector.broadcast %45 : vector<1x128xf32> to vector<16x128xf32>
    %53 = arith.subf %38, %52 : vector<16x128xf32>
    %cst_28 = arith.constant 9.99999974E-6 : f32
    %54 = vector.broadcast %cst_28 : f32 to vector<1x128xf32>
    %55 = arith.addf %51, %54 : vector<1x128xf32>
    %56 = math.rsqrt %55 : vector<1x128xf32>
    %57 = vector.broadcast %56 : vector<1x128xf32> to vector<16x128xf32>
    %58 = arith.mulf %53, %57 : vector<16x128xf32>
    %59 = vector.broadcast %19 : vector<1x128xf32> to vector<16x128xf32>
    %60 = arith.mulf %58, %59 : vector<16x128xf32>
    %61 = vector.broadcast %21 : vector<1x128xf32> to vector<16x128xf32>
    %62 = arith.addf %60, %61 : vector<16x128xf32>
    %63 = arith.truncf %62 : vector<16x128xf32> to vector<16x128xbf16>
    %c0_29 = arith.constant 0 : index
    %c1_30 = arith.constant 1 : index
    %c0_31 = arith.constant 0 : index
    %c0_32 = arith.constant 0 : index
    %64 = vector.load %arg4[%c0_29, %c1_30, %c0_31, %c0_32] : memref<2x3x128x128xbf16, #tpu.memory_space<vmem>>, vector<1x1x128x128xbf16>
    %65 = vector.shape_cast %64 : vector<1x1x128x128xbf16> to vector<128x128xbf16>
    %cst_33 = arith.constant dense<0.000000e+00> : vector<16x128xf32>
    %66 = tpu.matmul %63, %65, %cst_33 {dimension_numbers = #tpu.dot_dimension_numbers<[1], [0], [0], [1], [0, 0, 1, 1], [], []>} : vector<16x128xbf16>, vector<128x128xbf16>, vector<16x128xf32> -> vector<16x128xf32>
    %67 = arith.truncf %66 : vector<16x128xf32> to vector<16x128xbf16>
    %cst_34 = arith.constant dense<0.000000e+00> : vector<32x128xf32>
    %68 = tpu.matmul %17, %67, %cst_34 {dimension_numbers = #tpu.dot_dimension_numbers<[1], [0], [0], [1], [0, 0, 1, 1], [], []>} : vector<32x16xbf16>, vector<16x128xbf16>, vector<32x128xf32> -> vector<32x128xf32>
    %69 = vector.extract_strided_slice %68 {offsets = [0, 0], sizes = [16, 128], strides = [1, 1]} : vector<32x128xf32> to vector<16x128xf32>
    %70 = vector.extract_strided_slice %68 {offsets = [16, 0], sizes = [16, 128], strides = [1, 1]} : vector<32x128xf32> to vector<16x128xf32>
    %71 = arith.select %2, %69, %70 : vector<16x128xi1>, vector<16x128xf32>
    %c64_i32_35 = arith.constant 64 : i32
    %72 = tpu.dynamic_rotate %71 by %c64_i32_35 dim 1 : vector<16x128xf32>, i32 -> vector<16x128xf32>
    %73 = arith.addf %66, %72 : vector<16x128xf32>
    %c0_36 = arith.constant 0 : index
    %c3 = arith.constant 3 : index
    %c0_37 = arith.constant 0 : index
    %74 = vector.load %arg6[%c0_36, %c3, %c0_37] : memref<2x9x128xf32, #tpu.memory_space<vmem>>, vector<1x1x128xf32>
    %75 = vector.shape_cast %74 : vector<1x1x128xf32> to vector<1x128xf32>
    %76 = vector.broadcast %75 : vector<1x128xf32> to vector<16x128xf32>
    %77 = arith.addf %73, %76 : vector<16x128xf32>
    %cst_38 = arith.constant 0.000000e+00 : f32
    %78 = vector.broadcast %cst_38 : f32 to vector<16x128xf32>
    %79 = arith.maximumf %77, %78 : vector<16x128xf32>
    %cst_39 = arith.constant dense<0.000000e+00> : vector<128xf32>
    %80 = vector.multi_reduction <add>, %79, %cst_39 [0] : vector<16x128xf32> to vector<128xf32>
    %81 = vector.shape_cast %80 : vector<128xf32> to vector<1x128xf32>
    %82 = arith.mulf %79, %79 : vector<16x128xf32>
    %cst_40 = arith.constant dense<0.000000e+00> : vector<128xf32>
    %83 = vector.multi_reduction <add>, %82, %cst_40 [0] : vector<16x128xf32> to vector<128xf32>
    %84 = vector.shape_cast %83 : vector<128xf32> to vector<1x128xf32>
    %cst_41 = arith.constant 6.250000e-02 : f32
    %85 = vector.broadcast %cst_41 : f32 to vector<1x128xf32>
    %86 = arith.mulf %81, %85 : vector<1x128xf32>
    %cst_42 = arith.constant 6.250000e-02 : f32
    %87 = vector.broadcast %cst_42 : f32 to vector<1x128xf32>
    %88 = arith.mulf %84, %87 : vector<1x128xf32>
    %89 = arith.mulf %86, %86 : vector<1x128xf32>
    %90 = arith.subf %88, %89 : vector<1x128xf32>
    %cst_43 = arith.constant 0.000000e+00 : f32
    %91 = vector.broadcast %cst_43 : f32 to vector<1x128xf32>
    %92 = arith.maximumf %90, %91 : vector<1x128xf32>
    %93 = vector.broadcast %86 : vector<1x128xf32> to vector<16x128xf32>
    %94 = arith.subf %79, %93 : vector<16x128xf32>
    %cst_44 = arith.constant 9.99999974E-6 : f32
    %95 = vector.broadcast %cst_44 : f32 to vector<1x128xf32>
    %96 = arith.addf %92, %95 : vector<1x128xf32>
    %97 = math.rsqrt %96 : vector<1x128xf32>
    %98 = vector.broadcast %97 : vector<1x128xf32> to vector<16x128xf32>
    %99 = arith.mulf %94, %98 : vector<16x128xf32>
    %100 = vector.broadcast %19 : vector<1x128xf32> to vector<16x128xf32>
    %101 = arith.mulf %99, %100 : vector<16x128xf32>
    %102 = vector.broadcast %21 : vector<1x128xf32> to vector<16x128xf32>
    %103 = arith.addf %101, %102 : vector<16x128xf32>
    %104 = arith.truncf %103 : vector<16x128xf32> to vector<16x128xbf16>
    %c0_45 = arith.constant 0 : index
    %c2_46 = arith.constant 2 : index
    %c0_47 = arith.constant 0 : index
    %c0_48 = arith.constant 0 : index
    %105 = vector.load %arg4[%c0_45, %c2_46, %c0_47, %c0_48] : memref<2x3x128x128xbf16, #tpu.memory_space<vmem>>, vector<1x1x128x128xbf16>
    %106 = vector.shape_cast %105 : vector<1x1x128x128xbf16> to vector<128x128xbf16>
    %cst_49 = arith.constant dense<0.000000e+00> : vector<16x128xf32>
    %107 = tpu.matmul %104, %106, %cst_49 {dimension_numbers = #tpu.dot_dimension_numbers<[1], [0], [0], [1], [0, 0, 1, 1], [], []>} : vector<16x128xbf16>, vector<128x128xbf16>, vector<16x128xf32> -> vector<16x128xf32>
    %108 = arith.truncf %107 : vector<16x128xf32> to vector<16x128xbf16>
    %cst_50 = arith.constant dense<0.000000e+00> : vector<32x128xf32>
    %109 = tpu.matmul %17, %108, %cst_50 {dimension_numbers = #tpu.dot_dimension_numbers<[1], [0], [0], [1], [0, 0, 1, 1], [], []>} : vector<32x16xbf16>, vector<16x128xbf16>, vector<32x128xf32> -> vector<32x128xf32>
    %110 = vector.extract_strided_slice %109 {offsets = [0, 0], sizes = [16, 128], strides = [1, 1]} : vector<32x128xf32> to vector<16x128xf32>
    %111 = vector.extract_strided_slice %109 {offsets = [16, 0], sizes = [16, 128], strides = [1, 1]} : vector<32x128xf32> to vector<16x128xf32>
    %112 = arith.select %2, %110, %111 : vector<16x128xi1>, vector<16x128xf32>
    %c64_i32_51 = arith.constant 64 : i32
    %113 = tpu.dynamic_rotate %112 by %c64_i32_51 dim 1 : vector<16x128xf32>, i32 -> vector<16x128xf32>
    %114 = arith.addf %107, %113 : vector<16x128xf32>
    %c0_52 = arith.constant 0 : index
    %c4 = arith.constant 4 : index
    %c0_53 = arith.constant 0 : index
    %115 = vector.load %arg6[%c0_52, %c4, %c0_53] : memref<2x9x128xf32, #tpu.memory_space<vmem>>, vector<1x1x128xf32>
    %116 = vector.shape_cast %115 : vector<1x1x128xf32> to vector<1x128xf32>
    %117 = vector.broadcast %116 : vector<1x128xf32> to vector<16x128xf32>
    %118 = arith.addf %114, %117 : vector<16x128xf32>
    %cst_54 = arith.constant 0.000000e+00 : f32
    %119 = vector.broadcast %cst_54 : f32 to vector<16x128xf32>
    %120 = arith.maximumf %118, %119 : vector<16x128xf32>
    %cst_55 = arith.constant dense<0.000000e+00> : vector<128xf32>
    %121 = vector.multi_reduction <add>, %120, %cst_55 [0] : vector<16x128xf32> to vector<128xf32>
    %122 = vector.shape_cast %121 : vector<128xf32> to vector<1x128xf32>
    %123 = arith.mulf %120, %120 : vector<16x128xf32>
    %cst_56 = arith.constant dense<0.000000e+00> : vector<128xf32>
    %124 = vector.multi_reduction <add>, %123, %cst_56 [0] : vector<16x128xf32> to vector<128xf32>
    %125 = vector.shape_cast %124 : vector<128xf32> to vector<1x128xf32>
    %cst_57 = arith.constant 6.250000e-02 : f32
    %126 = vector.broadcast %cst_57 : f32 to vector<1x128xf32>
    %127 = arith.mulf %122, %126 : vector<1x128xf32>
    %cst_58 = arith.constant 6.250000e-02 : f32
    %128 = vector.broadcast %cst_58 : f32 to vector<1x128xf32>
    %129 = arith.mulf %125, %128 : vector<1x128xf32>
    %130 = arith.mulf %127, %127 : vector<1x128xf32>
    %131 = arith.subf %129, %130 : vector<1x128xf32>
    %cst_59 = arith.constant 0.000000e+00 : f32
    %132 = vector.broadcast %cst_59 : f32 to vector<1x128xf32>
    %133 = arith.maximumf %131, %132 : vector<1x128xf32>
    %134 = vector.broadcast %127 : vector<1x128xf32> to vector<16x128xf32>
    %135 = arith.subf %120, %134 : vector<16x128xf32>
    %cst_60 = arith.constant 9.99999974E-6 : f32
    %136 = vector.broadcast %cst_60 : f32 to vector<1x128xf32>
    %137 = arith.addf %133, %136 : vector<1x128xf32>
    %138 = math.rsqrt %137 : vector<1x128xf32>
    %139 = vector.broadcast %138 : vector<1x128xf32> to vector<16x128xf32>
    %140 = arith.mulf %135, %139 : vector<16x128xf32>
    %141 = vector.broadcast %19 : vector<1x128xf32> to vector<16x128xf32>
    %142 = arith.mulf %140, %141 : vector<16x128xf32>
    %143 = vector.broadcast %21 : vector<1x128xf32> to vector<16x128xf32>
    %144 = arith.addf %142, %143 : vector<16x128xf32>
    %c0_61 = arith.constant 0 : index
    %c0_62 = arith.constant 0 : index
    %c0_63 = arith.constant 0 : index
    %145 = vector.load %arg3[%c0_61, %c0_62, %c0_63] : memref<2x2x16xbf16, #tpu.memory_space<vmem>>, vector<1x2x16xbf16>
    %146 = vector.shape_cast %145 : vector<1x2x16xbf16> to vector<2x16xbf16>
    %147 = arith.truncf %144 : vector<16x128xf32> to vector<16x128xbf16>
    %cst_64 = arith.constant dense<0.000000e+00> : vector<2x128xf32>
    %148 = tpu.matmul %146, %147, %cst_64 {dimension_numbers = #tpu.dot_dimension_numbers<[1], [0], [0], [1], [0, 0, 1, 1], [], []>} : vector<2x16xbf16>, vector<16x128xbf16>, vector<2x128xf32> -> vector<2x128xf32>
    %149 = arith.truncf %148 : vector<2x128xf32> to vector<2x128xbf16>
    %c0_65 = arith.constant 0 : index
    %c0_66 = arith.constant 0 : index
    %c0_67 = arith.constant 0 : index
    %150 = vector.load %arg5[%c0_65, %c0_66, %c0_67] : memref<2x128x128xbf16, #tpu.memory_space<vmem>>, vector<1x128x128xbf16>
    %151 = vector.shape_cast %150 : vector<1x128x128xbf16> to vector<128x128xbf16>
    %cst_68 = arith.constant dense<0.000000e+00> : vector<2x128xf32>
    %152 = tpu.matmul %149, %151, %cst_68 {dimension_numbers = #tpu.dot_dimension_numbers<[1], [0], [0], [1], [0, 0, 1, 1], [], []>} : vector<2x128xbf16>, vector<128x128xbf16>, vector<2x128xf32> -> vector<2x128xf32>
    %c0_69 = arith.constant 0 : index
    %c7 = arith.constant 7 : index
    %c0_70 = arith.constant 0 : index
    %153 = vector.load %arg6[%c0_69, %c7, %c0_70] : memref<2x9x128xf32, #tpu.memory_space<vmem>>, vector<1x1x128xf32>
    %154 = vector.shape_cast %153 : vector<1x1x128xf32> to vector<1x128xf32>
    %155 = vector.broadcast %154 : vector<1x128xf32> to vector<2x128xf32>
    %156 = arith.addf %152, %155 : vector<2x128xf32>
    %cst_71 = arith.constant 0.000000e+00 : f32
    %157 = vector.broadcast %cst_71 : f32 to vector<2x128xf32>
    %158 = arith.maximumf %156, %157 : vector<2x128xf32>
    %c0_72 = arith.constant 0 : index
    %c8 = arith.constant 8 : index
    %c0_73 = arith.constant 0 : index
    %159 = vector.load %arg6[%c0_72, %c8, %c0_73] : memref<2x9x128xf32, #tpu.memory_space<vmem>>, vector<1x1x128xf32>
    %160 = vector.shape_cast %159 : vector<1x1x128xf32> to vector<1x128xf32>
    %161 = vector.broadcast %160 : vector<1x128xf32> to vector<2x128xf32>
    %162 = arith.mulf %158, %161 : vector<2x128xf32>
    %cst_74 = arith.constant dense<0.000000e+00> : vector<2xf32>
    %163 = vector.multi_reduction <add>, %162, %cst_74 [1] : vector<2x128xf32> to vector<2xf32>
    %164 = vector.shape_cast %163 : vector<2xf32> to vector<2x1xf32>
    %c1_75 = arith.constant 1 : index
    %c0_76 = arith.constant 0 : index
    %c0_77 = arith.constant 0 : index
    %165 = vector.load %arg1[%c1_75, %c0_76, %c0_77] : memref<2x16x1xf32, #tpu.memory_space<vmem>>, vector<1x16x1xf32>
    %166 = vector.shape_cast %165 : vector<1x16x1xf32> to vector<16x1xf32>
    %c1_78 = arith.constant 1 : index
    %c0_79 = arith.constant 0 : index
    %c0_80 = arith.constant 0 : index
    %167 = vector.load %arg6[%c1_78, %c0_79, %c0_80] : memref<2x9x128xf32, #tpu.memory_space<vmem>>, vector<1x1x128xf32>
    %168 = vector.shape_cast %167 : vector<1x1x128xf32> to vector<1x128xf32>
    %169 = vector.broadcast %166 : vector<16x1xf32> to vector<16x128xf32>
    %170 = vector.broadcast %168 : vector<1x128xf32> to vector<16x128xf32>
    %171 = arith.mulf %169, %170 : vector<16x128xf32>
    %c1_81 = arith.constant 1 : index
    %c1_82 = arith.constant 1 : index
    %c0_83 = arith.constant 0 : index
    %172 = vector.load %arg6[%c1_81, %c1_82, %c0_83] : memref<2x9x128xf32, #tpu.memory_space<vmem>>, vector<1x1x128xf32>
    %173 = vector.shape_cast %172 : vector<1x1x128xf32> to vector<1x128xf32>
    %174 = vector.broadcast %173 : vector<1x128xf32> to vector<16x128xf32>
    %175 = arith.addf %171, %174 : vector<16x128xf32>
    %cst_84 = arith.constant 0.000000e+00 : f32
    %176 = vector.broadcast %cst_84 : f32 to vector<16x128xf32>
    %177 = arith.maximumf %175, %176 : vector<16x128xf32>
    %c1_85 = arith.constant 1 : index
    %c0_86 = arith.constant 0 : index
    %c0_87 = arith.constant 0 : index
    %178 = vector.load %arg2[%c1_85, %c0_86, %c0_87] : memref<2x32x16xbf16, #tpu.memory_space<vmem>>, vector<1x32x16xbf16>
    %179 = vector.shape_cast %178 : vector<1x32x16xbf16> to vector<32x16xbf16>
    %c1_88 = arith.constant 1 : index
    %c5_89 = arith.constant 5 : index
    %c0_90 = arith.constant 0 : index
    %180 = vector.load %arg6[%c1_88, %c5_89, %c0_90] : memref<2x9x128xf32, #tpu.memory_space<vmem>>, vector<1x1x128xf32>
    %181 = vector.shape_cast %180 : vector<1x1x128xf32> to vector<1x128xf32>
    %c1_91 = arith.constant 1 : index
    %c6_92 = arith.constant 6 : index
    %c0_93 = arith.constant 0 : index
    %182 = vector.load %arg6[%c1_91, %c6_92, %c0_93] : memref<2x9x128xf32, #tpu.memory_space<vmem>>, vector<1x1x128xf32>
    %183 = vector.shape_cast %182 : vector<1x1x128xf32> to vector<1x128xf32>
    %184 = arith.truncf %177 : vector<16x128xf32> to vector<16x128xbf16>
    %c1_94 = arith.constant 1 : index
    %c0_95 = arith.constant 0 : index
    %c0_96 = arith.constant 0 : index
    %c0_97 = arith.constant 0 : index
    %185 = vector.load %arg4[%c1_94, %c0_95, %c0_96, %c0_97] : memref<2x3x128x128xbf16, #tpu.memory_space<vmem>>, vector<1x1x128x128xbf16>
    %186 = vector.shape_cast %185 : vector<1x1x128x128xbf16> to vector<128x128xbf16>
    %cst_98 = arith.constant dense<0.000000e+00> : vector<16x128xf32>
    %187 = tpu.matmul %184, %186, %cst_98 {dimension_numbers = #tpu.dot_dimension_numbers<[1], [0], [0], [1], [0, 0, 1, 1], [], []>} : vector<16x128xbf16>, vector<128x128xbf16>, vector<16x128xf32> -> vector<16x128xf32>
    %188 = arith.truncf %187 : vector<16x128xf32> to vector<16x128xbf16>
    %cst_99 = arith.constant dense<0.000000e+00> : vector<32x128xf32>
    %189 = tpu.matmul %179, %188, %cst_99 {dimension_numbers = #tpu.dot_dimension_numbers<[1], [0], [0], [1], [0, 0, 1, 1], [], []>} : vector<32x16xbf16>, vector<16x128xbf16>, vector<32x128xf32> -> vector<32x128xf32>
    %190 = vector.extract_strided_slice %189 {offsets = [0, 0], sizes = [16, 128], strides = [1, 1]} : vector<32x128xf32> to vector<16x128xf32>
    %191 = vector.extract_strided_slice %189 {offsets = [16, 0], sizes = [16, 128], strides = [1, 1]} : vector<32x128xf32> to vector<16x128xf32>
    %192 = arith.select %2, %190, %191 : vector<16x128xi1>, vector<16x128xf32>
    %c64_i32_100 = arith.constant 64 : i32
    %193 = tpu.dynamic_rotate %192 by %c64_i32_100 dim 1 : vector<16x128xf32>, i32 -> vector<16x128xf32>
    %194 = arith.addf %187, %193 : vector<16x128xf32>
    %c1_101 = arith.constant 1 : index
    %c2_102 = arith.constant 2 : index
    %c0_103 = arith.constant 0 : index
    %195 = vector.load %arg6[%c1_101, %c2_102, %c0_103] : memref<2x9x128xf32, #tpu.memory_space<vmem>>, vector<1x1x128xf32>
    %196 = vector.shape_cast %195 : vector<1x1x128xf32> to vector<1x128xf32>
    %197 = vector.broadcast %196 : vector<1x128xf32> to vector<16x128xf32>
    %198 = arith.addf %194, %197 : vector<16x128xf32>
    %cst_104 = arith.constant 0.000000e+00 : f32
    %199 = vector.broadcast %cst_104 : f32 to vector<16x128xf32>
    %200 = arith.maximumf %198, %199 : vector<16x128xf32>
    %cst_105 = arith.constant dense<0.000000e+00> : vector<128xf32>
    %201 = vector.multi_reduction <add>, %200, %cst_105 [0] : vector<16x128xf32> to vector<128xf32>
    %202 = vector.shape_cast %201 : vector<128xf32> to vector<1x128xf32>
    %203 = arith.mulf %200, %200 : vector<16x128xf32>
    %cst_106 = arith.constant dense<0.000000e+00> : vector<128xf32>
    %204 = vector.multi_reduction <add>, %203, %cst_106 [0] : vector<16x128xf32> to vector<128xf32>
    %205 = vector.shape_cast %204 : vector<128xf32> to vector<1x128xf32>
    %cst_107 = arith.constant 6.250000e-02 : f32
    %206 = vector.broadcast %cst_107 : f32 to vector<1x128xf32>
    %207 = arith.mulf %202, %206 : vector<1x128xf32>
    %cst_108 = arith.constant 6.250000e-02 : f32
    %208 = vector.broadcast %cst_108 : f32 to vector<1x128xf32>
    %209 = arith.mulf %205, %208 : vector<1x128xf32>
    %210 = arith.mulf %207, %207 : vector<1x128xf32>
    %211 = arith.subf %209, %210 : vector<1x128xf32>
    %cst_109 = arith.constant 0.000000e+00 : f32
    %212 = vector.broadcast %cst_109 : f32 to vector<1x128xf32>
    %213 = arith.maximumf %211, %212 : vector<1x128xf32>
    %214 = vector.broadcast %207 : vector<1x128xf32> to vector<16x128xf32>
    %215 = arith.subf %200, %214 : vector<16x128xf32>
    %cst_110 = arith.constant 9.99999974E-6 : f32
    %216 = vector.broadcast %cst_110 : f32 to vector<1x128xf32>
    %217 = arith.addf %213, %216 : vector<1x128xf32>
    %218 = math.rsqrt %217 : vector<1x128xf32>
    %219 = vector.broadcast %218 : vector<1x128xf32> to vector<16x128xf32>
    %220 = arith.mulf %215, %219 : vector<16x128xf32>
    %221 = vector.broadcast %181 : vector<1x128xf32> to vector<16x128xf32>
    %222 = arith.mulf %220, %221 : vector<16x128xf32>
    %223 = vector.broadcast %183 : vector<1x128xf32> to vector<16x128xf32>
    %224 = arith.addf %222, %223 : vector<16x128xf32>
    %225 = arith.truncf %224 : vector<16x128xf32> to vector<16x128xbf16>
    %c1_111 = arith.constant 1 : index
    %c1_112 = arith.constant 1 : index
    %c0_113 = arith.constant 0 : index
    %c0_114 = arith.constant 0 : index
    %226 = vector.load %arg4[%c1_111, %c1_112, %c0_113, %c0_114] : memref<2x3x128x128xbf16, #tpu.memory_space<vmem>>, vector<1x1x128x128xbf16>
    %227 = vector.shape_cast %226 : vector<1x1x128x128xbf16> to vector<128x128xbf16>
    %cst_115 = arith.constant dense<0.000000e+00> : vector<16x128xf32>
    %228 = tpu.matmul %225, %227, %cst_115 {dimension_numbers = #tpu.dot_dimension_numbers<[1], [0], [0], [1], [0, 0, 1, 1], [], []>} : vector<16x128xbf16>, vector<128x128xbf16>, vector<16x128xf32> -> vector<16x128xf32>
    %229 = arith.truncf %228 : vector<16x128xf32> to vector<16x128xbf16>
    %cst_116 = arith.constant dense<0.000000e+00> : vector<32x128xf32>
    %230 = tpu.matmul %179, %229, %cst_116 {dimension_numbers = #tpu.dot_dimension_numbers<[1], [0], [0], [1], [0, 0, 1, 1], [], []>} : vector<32x16xbf16>, vector<16x128xbf16>, vector<32x128xf32> -> vector<32x128xf32>
    %231 = vector.extract_strided_slice %230 {offsets = [0, 0], sizes = [16, 128], strides = [1, 1]} : vector<32x128xf32> to vector<16x128xf32>
    %232 = vector.extract_strided_slice %230 {offsets = [16, 0], sizes = [16, 128], strides = [1, 1]} : vector<32x128xf32> to vector<16x128xf32>
    %233 = arith.select %2, %231, %232 : vector<16x128xi1>, vector<16x128xf32>
    %c64_i32_117 = arith.constant 64 : i32
    %234 = tpu.dynamic_rotate %233 by %c64_i32_117 dim 1 : vector<16x128xf32>, i32 -> vector<16x128xf32>
    %235 = arith.addf %228, %234 : vector<16x128xf32>
    %c1_118 = arith.constant 1 : index
    %c3_119 = arith.constant 3 : index
    %c0_120 = arith.constant 0 : index
    %236 = vector.load %arg6[%c1_118, %c3_119, %c0_120] : memref<2x9x128xf32, #tpu.memory_space<vmem>>, vector<1x1x128xf32>
    %237 = vector.shape_cast %236 : vector<1x1x128xf32> to vector<1x128xf32>
    %238 = vector.broadcast %237 : vector<1x128xf32> to vector<16x128xf32>
    %239 = arith.addf %235, %238 : vector<16x128xf32>
    %cst_121 = arith.constant 0.000000e+00 : f32
    %240 = vector.broadcast %cst_121 : f32 to vector<16x128xf32>
    %241 = arith.maximumf %239, %240 : vector<16x128xf32>
    %cst_122 = arith.constant dense<0.000000e+00> : vector<128xf32>
    %242 = vector.multi_reduction <add>, %241, %cst_122 [0] : vector<16x128xf32> to vector<128xf32>
    %243 = vector.shape_cast %242 : vector<128xf32> to vector<1x128xf32>
    %244 = arith.mulf %241, %241 : vector<16x128xf32>
    %cst_123 = arith.constant dense<0.000000e+00> : vector<128xf32>
    %245 = vector.multi_reduction <add>, %244, %cst_123 [0] : vector<16x128xf32> to vector<128xf32>
    %246 = vector.shape_cast %245 : vector<128xf32> to vector<1x128xf32>
    %cst_124 = arith.constant 6.250000e-02 : f32
    %247 = vector.broadcast %cst_124 : f32 to vector<1x128xf32>
    %248 = arith.mulf %243, %247 : vector<1x128xf32>
    %cst_125 = arith.constant 6.250000e-02 : f32
    %249 = vector.broadcast %cst_125 : f32 to vector<1x128xf32>
    %250 = arith.mulf %246, %249 : vector<1x128xf32>
    %251 = arith.mulf %248, %248 : vector<1x128xf32>
    %252 = arith.subf %250, %251 : vector<1x128xf32>
    %cst_126 = arith.constant 0.000000e+00 : f32
    %253 = vector.broadcast %cst_126 : f32 to vector<1x128xf32>
    %254 = arith.maximumf %252, %253 : vector<1x128xf32>
    %255 = vector.broadcast %248 : vector<1x128xf32> to vector<16x128xf32>
    %256 = arith.subf %241, %255 : vector<16x128xf32>
    %cst_127 = arith.constant 9.99999974E-6 : f32
    %257 = vector.broadcast %cst_127 : f32 to vector<1x128xf32>
    %258 = arith.addf %254, %257 : vector<1x128xf32>
    %259 = math.rsqrt %258 : vector<1x128xf32>
    %260 = vector.broadcast %259 : vector<1x128xf32> to vector<16x128xf32>
    %261 = arith.mulf %256, %260 : vector<16x128xf32>
    %262 = vector.broadcast %181 : vector<1x128xf32> to vector<16x128xf32>
    %263 = arith.mulf %261, %262 : vector<16x128xf32>
    %264 = vector.broadcast %183 : vector<1x128xf32> to vector<16x128xf32>
    %265 = arith.addf %263, %264 : vector<16x128xf32>
    %266 = arith.truncf %265 : vector<16x128xf32> to vector<16x128xbf16>
    %c1_128 = arith.constant 1 : index
    %c2_129 = arith.constant 2 : index
    %c0_130 = arith.constant 0 : index
    %c0_131 = arith.constant 0 : index
    %267 = vector.load %arg4[%c1_128, %c2_129, %c0_130, %c0_131] : memref<2x3x128x128xbf16, #tpu.memory_space<vmem>>, vector<1x1x128x128xbf16>
    %268 = vector.shape_cast %267 : vector<1x1x128x128xbf16> to vector<128x128xbf16>
    %cst_132 = arith.constant dense<0.000000e+00> : vector<16x128xf32>
    %269 = tpu.matmul %266, %268, %cst_132 {dimension_numbers = #tpu.dot_dimension_numbers<[1], [0], [0], [1], [0, 0, 1, 1], [], []>} : vector<16x128xbf16>, vector<128x128xbf16>, vector<16x128xf32> -> vector<16x128xf32>
    %270 = arith.truncf %269 : vector<16x128xf32> to vector<16x128xbf16>
    %cst_133 = arith.constant dense<0.000000e+00> : vector<32x128xf32>
    %271 = tpu.matmul %179, %270, %cst_133 {dimension_numbers = #tpu.dot_dimension_numbers<[1], [0], [0], [1], [0, 0, 1, 1], [], []>} : vector<32x16xbf16>, vector<16x128xbf16>, vector<32x128xf32> -> vector<32x128xf32>
    %272 = vector.extract_strided_slice %271 {offsets = [0, 0], sizes = [16, 128], strides = [1, 1]} : vector<32x128xf32> to vector<16x128xf32>
    %273 = vector.extract_strided_slice %271 {offsets = [16, 0], sizes = [16, 128], strides = [1, 1]} : vector<32x128xf32> to vector<16x128xf32>
    %274 = arith.select %2, %272, %273 : vector<16x128xi1>, vector<16x128xf32>
    %c64_i32_134 = arith.constant 64 : i32
    %275 = tpu.dynamic_rotate %274 by %c64_i32_134 dim 1 : vector<16x128xf32>, i32 -> vector<16x128xf32>
    %276 = arith.addf %269, %275 : vector<16x128xf32>
    %c1_135 = arith.constant 1 : index
    %c4_136 = arith.constant 4 : index
    %c0_137 = arith.constant 0 : index
    %277 = vector.load %arg6[%c1_135, %c4_136, %c0_137] : memref<2x9x128xf32, #tpu.memory_space<vmem>>, vector<1x1x128xf32>
    %278 = vector.shape_cast %277 : vector<1x1x128xf32> to vector<1x128xf32>
    %279 = vector.broadcast %278 : vector<1x128xf32> to vector<16x128xf32>
    %280 = arith.addf %276, %279 : vector<16x128xf32>
    %cst_138 = arith.constant 0.000000e+00 : f32
    %281 = vector.broadcast %cst_138 : f32 to vector<16x128xf32>
    %282 = arith.maximumf %280, %281 : vector<16x128xf32>
    %cst_139 = arith.constant dense<0.000000e+00> : vector<128xf32>
    %283 = vector.multi_reduction <add>, %282, %cst_139 [0] : vector<16x128xf32> to vector<128xf32>
    %284 = vector.shape_cast %283 : vector<128xf32> to vector<1x128xf32>
    %285 = arith.mulf %282, %282 : vector<16x128xf32>
    %cst_140 = arith.constant dense<0.000000e+00> : vector<128xf32>
    %286 = vector.multi_reduction <add>, %285, %cst_140 [0] : vector<16x128xf32> to vector<128xf32>
    %287 = vector.shape_cast %286 : vector<128xf32> to vector<1x128xf32>
    %cst_141 = arith.constant 6.250000e-02 : f32
    %288 = vector.broadcast %cst_141 : f32 to vector<1x128xf32>
    %289 = arith.mulf %284, %288 : vector<1x128xf32>
    %cst_142 = arith.constant 6.250000e-02 : f32
    %290 = vector.broadcast %cst_142 : f32 to vector<1x128xf32>
    %291 = arith.mulf %287, %290 : vector<1x128xf32>
    %292 = arith.mulf %289, %289 : vector<1x128xf32>
    %293 = arith.subf %291, %292 : vector<1x128xf32>
    %cst_143 = arith.constant 0.000000e+00 : f32
    %294 = vector.broadcast %cst_143 : f32 to vector<1x128xf32>
    %295 = arith.maximumf %293, %294 : vector<1x128xf32>
    %296 = vector.broadcast %289 : vector<1x128xf32> to vector<16x128xf32>
    %297 = arith.subf %282, %296 : vector<16x128xf32>
    %cst_144 = arith.constant 9.99999974E-6 : f32
    %298 = vector.broadcast %cst_144 : f32 to vector<1x128xf32>
    %299 = arith.addf %295, %298 : vector<1x128xf32>
    %300 = math.rsqrt %299 : vector<1x128xf32>
    %301 = vector.broadcast %300 : vector<1x128xf32> to vector<16x128xf32>
    %302 = arith.mulf %297, %301 : vector<16x128xf32>
    %303 = vector.broadcast %181 : vector<1x128xf32> to vector<16x128xf32>
    %304 = arith.mulf %302, %303 : vector<16x128xf32>
    %305 = vector.broadcast %183 : vector<1x128xf32> to vector<16x128xf32>
    %306 = arith.addf %304, %305 : vector<16x128xf32>
    %c1_145 = arith.constant 1 : index
    %c0_146 = arith.constant 0 : index
    %c0_147 = arith.constant 0 : index
    %307 = vector.load %arg3[%c1_145, %c0_146, %c0_147] : memref<2x2x16xbf16, #tpu.memory_space<vmem>>, vector<1x2x16xbf16>
    %308 = vector.shape_cast %307 : vector<1x2x16xbf16> to vector<2x16xbf16>
    %309 = arith.truncf %306 : vector<16x128xf32> to vector<16x128xbf16>
    %cst_148 = arith.constant dense<0.000000e+00> : vector<2x128xf32>
    %310 = tpu.matmul %308, %309, %cst_148 {dimension_numbers = #tpu.dot_dimension_numbers<[1], [0], [0], [1], [0, 0, 1, 1], [], []>} : vector<2x16xbf16>, vector<16x128xbf16>, vector<2x128xf32> -> vector<2x128xf32>
    %311 = arith.truncf %310 : vector<2x128xf32> to vector<2x128xbf16>
    %c1_149 = arith.constant 1 : index
    %c0_150 = arith.constant 0 : index
    %c0_151 = arith.constant 0 : index
    %312 = vector.load %arg5[%c1_149, %c0_150, %c0_151] : memref<2x128x128xbf16, #tpu.memory_space<vmem>>, vector<1x128x128xbf16>
    %313 = vector.shape_cast %312 : vector<1x128x128xbf16> to vector<128x128xbf16>
    %cst_152 = arith.constant dense<0.000000e+00> : vector<2x128xf32>
    %314 = tpu.matmul %311, %313, %cst_152 {dimension_numbers = #tpu.dot_dimension_numbers<[1], [0], [0], [1], [0, 0, 1, 1], [], []>} : vector<2x128xbf16>, vector<128x128xbf16>, vector<2x128xf32> -> vector<2x128xf32>
    %c1_153 = arith.constant 1 : index
    %c7_154 = arith.constant 7 : index
    %c0_155 = arith.constant 0 : index
    %315 = vector.load %arg6[%c1_153, %c7_154, %c0_155] : memref<2x9x128xf32, #tpu.memory_space<vmem>>, vector<1x1x128xf32>
    %316 = vector.shape_cast %315 : vector<1x1x128xf32> to vector<1x128xf32>
    %317 = vector.broadcast %316 : vector<1x128xf32> to vector<2x128xf32>
    %318 = arith.addf %314, %317 : vector<2x128xf32>
    %cst_156 = arith.constant 0.000000e+00 : f32
    %319 = vector.broadcast %cst_156 : f32 to vector<2x128xf32>
    %320 = arith.maximumf %318, %319 : vector<2x128xf32>
    %c1_157 = arith.constant 1 : index
    %c8_158 = arith.constant 8 : index
    %c0_159 = arith.constant 0 : index
    %321 = vector.load %arg6[%c1_157, %c8_158, %c0_159] : memref<2x9x128xf32, #tpu.memory_space<vmem>>, vector<1x1x128xf32>
    %322 = vector.shape_cast %321 : vector<1x1x128xf32> to vector<1x128xf32>
    %323 = vector.broadcast %322 : vector<1x128xf32> to vector<2x128xf32>
    %324 = arith.mulf %320, %323 : vector<2x128xf32>
    %cst_160 = arith.constant dense<0.000000e+00> : vector<2xf32>
    %325 = vector.multi_reduction <add>, %324, %cst_160 [1] : vector<2x128xf32> to vector<2xf32>
    %326 = vector.shape_cast %325 : vector<2xf32> to vector<2x1xf32>
    %327 = tpu.concatenate %164, %326 in 0 : vector<2x1xf32>, vector<2x1xf32> -> vector<4x1xf32>
    %c0_161 = arith.constant 0 : index
    %c0_162 = arith.constant 0 : index
    %c0_163 = arith.constant 0 : index
    %328 = vector.load %arg7[%c0_161, %c0_162, %c0_163] : memref<1x4x1xf32, #tpu.memory_space<vmem>>, vector<1x4x1xf32>
    %329 = vector.shape_cast %328 : vector<1x4x1xf32> to vector<4x1xf32>
    %330 = vector.shape_cast %327 : vector<4x1xf32> to vector<1x4x1xf32>
    tpu.vector_store %arg7[%c0_161, %c0_162, %c0_163], %330 {strides = array<i32>} : memref<1x4x1xf32, #tpu.memory_space<vmem>>, vector<1x4x1xf32>,
    return
  }
  func.func @transform_0(%arg0: i32) -> (i32, i32, i32) {
    %c0_i32 = arith.constant 0 : i32
    %c0_i32_0 = arith.constant 0 : i32
    %c0_i32_1 = arith.constant 0 : i32
    return %arg0, %c0_i32, %c0_i32_0 : i32, i32, i32
  }
  func.func @transform_1(%arg0: i32) -> (i32, i32, i32) {
    %c0_i32 = arith.constant 0 : i32
    %c0_i32_0 = arith.constant 0 : i32
    %c0_i32_1 = arith.constant 0 : i32
    return %arg0, %c0_i32, %c0_i32_0 : i32, i32, i32
  }
  func.func @transform_2(%arg0: i32) -> (i32, i32, i32) {
    %c0_i32 = arith.constant 0 : i32
    %c0_i32_0 = arith.constant 0 : i32
    %c0_i32_1 = arith.constant 0 : i32
    return %arg0, %c0_i32, %c0_i32_0 : i32, i32, i32
  }
  func.func @transform_3(%arg0: i32) -> (i32, i32, i32, i32) {
    %c0_i32 = arith.constant 0 : i32
    %c0_i32_0 = arith.constant 0 : i32
    %c0_i32_1 = arith.constant 0 : i32
    %c0_i32_2 = arith.constant 0 : i32
    return %arg0, %c0_i32, %c0_i32_0, %c0_i32_1 : i32, i32, i32, i32
  }
  func.func @transform_4(%arg0: i32) -> (i32, i32, i32) {
    %c0_i32 = arith.constant 0 : i32
    %c0_i32_0 = arith.constant 0 : i32
    %c0_i32_1 = arith.constant 0 : i32
    return %arg0, %c0_i32, %c0_i32_0 : i32, i32, i32
  }
  func.func @transform_5(%arg0: i32) -> (i32, i32, i32) {
    %c0_i32 = arith.constant 0 : i32
    %c0_i32_0 = arith.constant 0 : i32
    %c0_i32_1 = arith.constant 0 : i32
    return %arg0, %c0_i32, %c0_i32_0 : i32, i32, i32
  }
  func.func @transform_6(%arg0: i32) -> (i32, i32, i32) {
    %c0_i32 = arith.constant 0 : i32
    %c0_i32_0 = arith.constant 0 : i32
    %c0_i32_1 = arith.constant 0 : i32
    return %arg0, %c0_i32, %c0_i32_0 : i32, i32, i32
  }
}

</mosaic_0001>

<bundles_post_ra>
// kernel: tpu_custom_call.1
= control target key start
LH: loop header
LB: loop body
LE: loop exit
PB: predicated region body
PF: predicated region fallthrough
CT: control target
= control target key end

     0   :  { %11 = vsyncpa [#allocation3], 0  ;;  %s3419_s0 = inlined_call_operand.vmem [shape: f32[4,16,1], index: 0, kind: input, shape index: {}]   ;;  %s3420_s1 = inlined_call_operand.vmem [shape: bf16[4,32,16], index: 1, kind: input, shape index: {}]   ;;  %s3421_s2 = inlined_call_operand.vmem [shape: bf16[4,2,16], index: 2, kind: input, shape index: {}]   ;;  %s3422_s3 = inlined_call_operand.hbm [shape: bf16[4,3,128,128], index: 3, kind: input, shape index: {}]   ;;  %s3423_s4 = inlined_call_operand.vmem [shape: bf16[4,128,128], index: 4, kind: input, shape index: {}]   ;;  %s3424_s5 = inlined_call_operand.vmem [shape: f32[4,9,128], index: 5, kind: input, shape index: {}]   ;;  %s3425_s6 = inlined_call_operand.vmem [shape: f32[2,4,1], index: 6, kind: output, shape index: {}]  }
   0x1   :  { %13 = vsyncpa [#allocation3 + $0x1], 0  ;;  %s2984_s21 = smov 0   ;;  %s2986_s22 = smov 0  }
   0x2   :  { %s2988_s23 = smov 0   ;;  %s2990_s24 = smov 0  }
   0x3 LB: > { %s3003_s25 = sadd.s32 4294967295, %s2940_s24   ;;  %s3006_s26 = sadd.s32 1, %s2940_s24   ;;  %s2940_s24 = sphi %s2990_s24, %s3432_s24   ;;  %s2936_s23 = sphi %s2988_s23, %s3431_s23   ;;  %s2932_s22 = sphi %s2986_s22, %s3430_s22   ;;  %s2928_s21 = sphi %s2984_s21, %s3429_s21  }
   0x4   : > { %s101_s27 = ssub.s32 %s2940_s24, %s3006_s26  ;;  %s104_s28 = sadd.s32 1, %s2936_s23 }
   0x5   : > { %p102_p0 = scmp.eq.s32.totalorder %s101_s27, 0  ;;  %p111_p1 = scmp.ne.s32.totalorder %s2936_s23, %s2932_s22 }
   0x6   : > { %p112_p2 = scmp.eq.s32.totalorder %s2940_s24, 0  ;;  %p117_p3 = scmp.ne.s32.totalorder %s2932_s22, %s2928_s21 }
   0x7   : > { %s3016_s29 = scalar_select %p102_p0, %s2936_s23, %s104_s28  }
   0x8   : > { %p113_p4 = por %p112_p2, %p111_p1  ;;  %p118_p5 = scmp.eq.s32.totalorder %s3003_s25, 0 }
   0x9   : > { %p2755_p6 = scmp.lt.s32.totalorder %s2940_s24, 2  ;;  %s247_s7 = sand.u32 1, %s2936_s23  }
   0xa   : > { %p3020_p7 = por %p118_p5, %p117_p3  ;;  %s2746_s8 = smul.u32 384, %s247_s7 }
   0xb   : > { %s2747_s9 = smul.u32 6144, %s2940_s24  ;;  %p3026_p8 = pnand %p2755_p6, %p113_p4 }
   0xc   : > { %s251_s14 = scalar_lea.vmem [#allocation2], %s2746_s8  ;;  %s3038_s16 = scalar_lea.sflag [#allocation3], %s247_s7 }
   0xd   : > { %s3033_s13 = scalar_lea.hbm %s3422_s3, %s2747_s9  ;;  %s259_s15 = sshll.u32 %s251_s14, 4  ;;  %s3035_s15 = int_to_ptr.vmem [resolvable:$true] %s259_s15 }
   0xe   : > { %s2876_s17 = scalar_lea.hbm %s3033_s13, 6144  ;;  %p2878_p11 = pneg %p3026_p8 }
   0xf   : > { %p2877_p10 = scmp.ne.s32.totalorder %s3033_s13, %s2876_s17  ;;  %s2881_s20 = scalar_lea.hbm %s3422_s3, 12288 }
  0x10   : > { %p2882_p0 = scmp.lt.u32.totalorder %s3033_s13, %s3422_s3  ;;  %p2883_p1 = scmp.lt.u32.totalorder %s2881_s20, %s2876_s17 }
  0x11   : > { %p2879_p12 = pnand %p2878_p11, %p2877_p10  ;;  %p2885_p3 = scmp.lt.u32.totalorder %s2876_s17, %s3033_s13 }
  0x12   : > { %p2884_p2 = por %p2883_p1, %p2882_p0 }
  0x13   : > { %p2880_p13 = pneg %p2879_p12 }
  0x14   : > { %p2886_p4 = por %p2885_p3, %p2884_p2 }
  0x16   : > { %p2887_p5 = pnand %p2886_p4, %p2880_p13 }
  0x18   : > { %2890 = shalt.err (!%p2887_p5)
}
  0x19   : > { %s2891_s28 = scalar_lea.vmem %s3035_s15, 6144  ;;  %s2942_s7 = smov [#allocation2]  }
  0x1a   : > { %p2892_p6 = scmp.ne.s32.totalorder %s3035_s15, %s2891_s28  ;;  %s2896_s8 = sshll.u32 %s2942_s7, 4  ;;  %s2897_s8 = int_to_ptr.vmem [resolvable:$false] %s2896_s8 }
  0x1b   : > { %s2898_s9 = scalar_lea.vmem %s2897_s8, 12288  ;;  %p2899_p9 = scmp.lt.s32.totalorder %s3035_s15, %s2897_s8 }
  0x1c   : > { %p2894_p10 = pnand %p2892_p6, %p2878_p11  ;;  %p2900_p0 = scmp.lt.s32.totalorder %s2898_s9, %s2891_s28 }
  0x1e   : > { %p2895_p12 = pneg %p2894_p10  ;;  %p2901_p1 = por %p2900_p0, %p2899_p9 }
  0x20   : > { %p2902_p2 = pnand %p2901_p1, %p2895_p12 }
  0x22   : > { %2905 = shalt.err (!%p2902_p2)
}
  0x23   : > { %s2943_s11 = smov 64   ;;  %s2944_s12 = smov 4  }
  0x24   : > { %2754 = dma.hbm_to_vmem [thread:$0]  (!%p3026_p8), %s3033_s13, 6144, %s3035_s15, %s3038_s16, %s2943_s11, %s2943_s11, %s2944_s12  }
  0x25   : > { %p287_p11 = scmp.lt.s32.totalorder %s2940_s24, 3  ;;  %p3428_p13 = scmp.ge.s32.totalorder %s2940_s24, 1 }
  0x27   : > { %p288_p3 = pnand %p3428_p13, %p287_p11 }
  0x28   : > { %s293_s14 = sand.u32 (!%p288_p3), 1, %s2932_s22  }
  0x29   : > { %291 = sbr.rel (%p288_p3) target bundleno = 4385 (0x1121), region = 44  ;;  %s294_s18 = scalar_lea.sflag (!%p288_p3), [#allocation3], %s293_s14 }
  0x2a   : > { %s2748_s17 = smul.u32 (!%p288_p3), 384, %s293_s14 }
  0x2c   : > { %s3070_s19 = scalar_lea.vmem (!%p288_p3), [#allocation2], %s2748_s17 }
  0x30   : > { %2923 = dma.done.wait (%p3020_p7), %s294_s18, 6144  }
  0x31   : > { %2925 = vsyncadd (%p3020_p7), %s294_s18, 4294961152  ;;  %s2212_s10 = sshll.u32 %s3003_s25, 1  ;;  %v2945_v0 = vmov 0   ;;  %v2946_v1 = vmov 0.0   ;;  %v2796_v3 = vld [vmem:[%s3070_s19] sm:$0xff]   ;;  %v2797_v5 = vld [vmem:[%s3070_s19 + $0x8] sm:$0xff]   ;;  %v392_v30 = vlaneseq }
  0x32   : > { %2794 = vset.pattern.permute.xlu0 %v2945_v0  ;;  %p354_p8 = scmp.lt.s32.totalorder %s2212_s10, 3  ;;  %2538 = vmatprep.subr.bf16.mxu0 %v2946_v1  ;;  %v2798_v6 = vld [vmem:[%s3070_s19 + $0x10] sm:$0xff]   ;;  %v2799_v7 = vld [vmem:[%s3070_s19 + $0x18] sm:$0xff]   ;;  %vm2947_vm0 = vmmov 0   ;;  %v2800_v8 = vld [vmem:[%s3070_s19 + $0x20] sm:$0xff]   ;;  %vm546_vm1 = vcmask 130048  }
  0x33   : > { %2564 = vmatprep.subr.bf16.mxu1 %v2946_v1  ;;  %2795 = vset.pattern.permute.xlu1 %v2945_v0  ;;  %v2801_v9 = vld [vmem:[%s3070_s19 + $0x28] sm:$0xff]   ;;  %v2802_v10 = vld [vmem:[%s3070_s19 + $0x30] sm:$0xff]   ;;  %v2803_v11 = vld [vmem:[%s3070_s19 + $0x38] sm:$0xff]   ;;  %v3143_v31 = vand.u32 127, %v392_v30  ;;  %s2948_s14 = smov 64   ;;  %vm1230_vm3 = vcmask 1041408  }
  0x34   : > { %s3434_s10 = smov (!%p354_p8, %s2212_s10), 3  ;;  %2539 = vmatpush3.bf16.msra.mxu0 %v2796_v3  ;;  %2554 = vmatprep.mubr.msk.bf16.mxu0 %vm2947_vm0, %v2946_v1  ;;  %v2806_v38 = vld [vmem:[%s3070_s19 + $0x40] sm:$0xff]   ;;  %v2807_v39 = vld [vmem:[%s3070_s19 + $0x48] sm:$0xff]   ;;  %v2808_v40 = vld [vmem:[%s3070_s19 + $0x50] sm:$0xff]   ;;  %p387_p7 = scmp.lt.s32.totalorder %s3003_s25, 1  ;;  %vm2081_vm4 = vcmask 3072  }
  0x35   : > { %s3082_s24 = sshll.u32 %s3434_s10, 4  ;;  %2540 = vmatprep.subr.bf16.mxu0 %v2946_v1  ;;  %s2442_s27 = sshll.u32 %s3434_s10, 6  ;;  %2580 = vmatprep.mubr.msk.bf16.mxu1 %vm2947_vm0, %v2946_v1  ;;  %vm394_vm2 = vcmp.lt.s32.totalorder %v3143_v31, 96  ;;  %v2809_v41 = vld [vmem:[%s3070_s19 + $0x58] sm:$0xff]   ;;  %v2810_v42 = vld [vmem:[%s3070_s19 + $0x60] sm:$0xff]   ;;  %v2811_v43 = vld [vmem:[%s3070_s19 + $0x68] sm:$0xff]  }
  0x36   : > { %s3088_s15 = scalar_lea.vmem %s3419_s0, %s3082_s24  ;;  %s3100_s21 = scalar_lea.vmem %s3420_s1, %s3082_s24  ;;  %2565 = vmatpush3.bf16.msra.mxu1 %v2806_v38  ;;  %v2812_v44 = vld [vmem:[%s3070_s19 + $0x70] sm:$0xff]   ;;  %v2813_v45 = vld [vmem:[%s3070_s19 + $0x78] sm:$0xff]  }
  0x37   : > { %v395_v2 = vld [vmem:[%s3088_s15] sm:$0xff]  ;;  %v396_v4 = vld [vmem:[%s3088_s15 + $0x8] sm:$0xff]  ;;  %s3119_s8 = scalar_lea.vmem %s3423_s4, %s2442_s27  ;;  %s3127_s12 = scalar_lea.vmem %s3424_s5, %s3082_s24  ;;  %2566 = vmatprep.subr.bf16.mxu1 %v2946_v1 }
  0x38   : > { %400 = vperm.xlu0 %2794, %v395_v2   ;;  %2541 = vmatpush3.bf16.msra.mxu0 %v2797_v5  ;;  %v2226_v12 = vld [vmem:[%s3127_s12] ss:$0 sm:$0xff]  ;;  %v2227_v15 = vld [vmem:[%s3127_s12 + $0x1] ss:$0 sm:$0xff]  ;;  %v3137_v29 = vld [vmem:[%s3100_s21 + $0x8] sm:$0xff]   ;;  %s3256_s24 = scalar_lea.vmem %s3421_s2, %s3434_s10  ;;  %s3436_s25 = smov (!%p387_p7, %s3003_s25), 1 }
  0x39   : > { %2542 = vmatprep.subr.bf16.mxu0 %v2946_v1  ;;  %v3132_v23 = vld [vmem:[%s3100_s21] sm:$0xff]   ;;  %v2857_v31 = vld [vmem:[%s3119_s8 + $0x48] sm:$0xff]  }
  0x3a   : > { %2567 = vmatpush3.bf16.msra.mxu1 %v2807_v39  ;;  %v2240_v46 = vld [vmem:[%s3127_s12 + $0x2] ss:$0 sm:$0xff] }
  0x3b   : > { %2568 = vmatprep.subr.bf16.mxu1 %v2946_v1 }
  0x3c   : > { %405 = vperm.xlu0 %2794, %v396_v4   ;;  %2543 = vmatpush3.bf16.msra.mxu0 %v2798_v6 }
  0x3d   : > { %2544 = vmatprep.subr.bf16.mxu0 %v2946_v1 }
  0x3e   : > { %2569 = vmatpush3.bf16.msra.mxu1 %v2808_v40  ;;  %v2814_v40 = vld [vmem:[%s3070_s19 + $0x80] sm:$0xff]  }
  0x3f   : > { %2570 = vmatprep.subr.bf16.mxu1 %v2946_v1 }
  0x40   : > { %2545 = vmatpush3.bf16.msra.mxu0 %v2799_v7 }
  0x41   : > { %2546 = vmatprep.subr.bf16.mxu0 %v2946_v1 }
  0x42   : > { %2571 = vmatpush3.bf16.msra.mxu1 %v2809_v41  ;;  %v2816_v41 = vld [vmem:[%s3070_s19 + $0x90] sm:$0xff]  }
  0x43   : > { %2572 = vmatprep.subr.bf16.mxu1 %v2946_v1 }
  0x44   : > { %2547 = vmatpush3.bf16.msra.mxu0 %v2800_v8 }
  0x45   : > { %2548 = vmatprep.subr.bf16.mxu0 %v2946_v1 }
  0x46   : > { %2573 = vmatpush3.bf16.msra.mxu1 %v2810_v42  ;;  %v2817_v42 = vld [vmem:[%s3070_s19 + $0x98] sm:$0xff]  }
  0x47   : > { %2574 = vmatprep.subr.bf16.mxu1 %v2946_v1 }
  0x48   : > { %2549 = vmatpush3.bf16.msra.mxu0 %v2801_v9 }
  0x49   : > { %2550 = vmatprep.subr.bf16.mxu0 %v2946_v1 }
  0x4a   : > { %2575 = vmatpush3.bf16.msra.mxu1 %v2811_v43  ;;  %v2818_v43 = vld [vmem:[%s3070_s19 + $0xa0] sm:$0xff]  }
  0x4b   : > { %2576 = vmatprep.subr.bf16.mxu1 %v2946_v1 }
  0x4c   : > { %2551 = vmatpush3.bf16.msra.mxu0 %v2802_v10 }
  0x4d   : > { %2552 = vmatprep.subr.bf16.mxu0 %v2946_v1 }
  0x4e   : > { %2577 = vmatpush3.bf16.msra.mxu1 %v2812_v44  ;;  %v2819_v44 = vld [vmem:[%s3070_s19 + $0xa8] sm:$0xff]  }
  0x4f   : > { %2578 = vmatprep.subr.bf16.mxu1 %v2946_v1 }
  0x50   : > { %2553 = vmatpush3.bf16.msra.mxu0 %v2803_v11 }
  0x52   : > { %2579 = vmatpush3.bf16.msra.mxu1 %v2813_v45  ;;  %v2820_v45 = vld [vmem:[%s3070_s19 + $0xb0] sm:$0xff]  }
  0x53   : > { %2590 = vmatprep.subr.bf16.mxu1 %v2946_v1 }
  0xb7   : > { %v401_v13 = vpop.permute.xlu0 %400 }
  0xb8   : > { %v412_v14 = vmul.f32 %v2226_v12, %v401_v13 }
  0xba   : > { %v419_v17 = vadd.f32 %v2227_v15, %v412_v14 }
  0xbb   : > { %v406_v16 = vpop.permute.xlu0 %405 }
  0xbc   : > { %v413_v18 = vmul.f32 %v2226_v12, %v406_v16  ;;  %v421_v20 = vmax.f32 %v419_v17, 0.0  ;;  %v3170_v17 = vld [vmem:[%s3127_s12 + $0x5] ss:$0 sm:$0xff] }
  0xbe   : > { %v420_v19 = vadd.f32 %v2227_v15, %v413_v18 }
  0xc0   : > { %v422_v21 = vmax.f32 %v420_v19, 0.0 }
  0xc2   : > { %v429_v22 = vpack.c.bf16 %v422_v21, %v421_v20  ;;  %v3173_v20 = vld [vmem:[%s3127_s12 + $0x6] ss:$0 sm:$0xff] }
  0xc4   : > { %2555 = vmatmul.mubr.bf16.vlgmr.msra.gmra.mrb[0].mxu0 %v429_v22 }
  0xc5   : > { %2560 = vmatprep.mubr.msk.bf16.mxu0 %vm546_vm1, %v3132_v23 }
 0x197   : > { %v528_v24 = vpop.f32.mrb[0].mxu0 }
 0x198   : > { %v2556_v25 = vpop.f32.mrb[1].mxu0 }
 0x199   : > { %v531_v26 = vpop.f32.mrb[2].mxu0 }
 0x19a   : > { %v535_v27 = vpack.c.bf16 %v531_v26, %v528_v24  ;;  %v2557_v28 = vpop.f32.mrb[3].mxu0 }
 0x19c   : > { %2558 = vmatprep.subr.bf16.mxu0 %v535_v27 }
 0x19d   : > { %2559 = vmatpush3.bf16.msra.mxu0 %v535_v27 }
 0x1a0   : > { %2561 = vmatmul.mubr.msk.bf16.vlgmr.msra.gmra.mrb[4].mxu0 %vm546_vm1, %v3137_v29 }
 0x1a1   : > { %2586 = vmatprep.mubr.msk.bf16.mxu0 %vm546_vm1, %v3132_v23 }
 0x273   : > { %v2562_v32 = vpop.f32.mrb[4].mxu0 }
 0x274   : > { %v587_v33 = vpop.f32.mrb[5].mxu0 }
 0x275   : > { %v2563_v34 = vpop.f32.mrb[6].mxu0  ;;  %v602_v35 = vsel %vm394_vm2, %v587_v33, %v2562_v32 }
 0x276   : > { %604 = vrot.lane.b32.xlu1 %v602_v35, %s2948_s14  ;;  %v590_v36 = vpop.f32.mrb[7].mxu0 }
 0x277   : > { %v603_v37 = vsel %vm394_vm2, %v590_v36, %v2563_v34 }
 0x27a   : > { %606 = vrot.lane.b32.xlu1 %v603_v37, %s2948_s14 }
 0x2e8   : > { %v605_v47 = vpop.permute.xlu1 %604 }
 0x2e9   : > { %v608_v48 = vadd.f32 %v605_v47, %v528_v24  ;;  %v2269_v47 = vld [vmem:[%s3127_s12 + $0x3] ss:$0 sm:$0xff] }
 0x2eb   : > { %v615_v49 = vadd.f32 %v2240_v46, %v608_v48 }
 0x2ec   : > { %v607_v50 = vpop.permute.xlu1 %606 }
 0x2ed   : > { %v609_v51 = vadd.f32 %v607_v50, %v531_v26  ;;  %v617_v52 = vmax.f32 %v615_v49, 0.0 }
 0x2ef   : > { %v616_v53 = vadd.f32 %v2240_v46, %v609_v51  ;;  %v626_v55 = vmul.f32 %v617_v52, %v617_v52  ;;  %v2821_v46 = vld [vmem:[%s3070_s19 + $0xb8] sm:$0xff]  }
 0x2f1   : > { %v618_v54 = vmax.f32 %v616_v53, 0.0 }
 0x2f3   : > { %v619_v56 = vadd.f32 %v618_v54, %v617_v52  ;;  %v627_v57 = vmul.f32 %v618_v54, %v618_v54 }
 0x2f5   : > { %v620_v58 = vrot.slane %v619_v56, 4  ;;  %v628_v59 = vadd.f32 %v627_v57, %v626_v55 }
 0x2f7   : > { %v621_v60 = vadd.f32 %v620_v58, %v619_v56  ;;  %v629_v61 = vrot.slane %v628_v59, 4 }
 0x2f9   : > { %v622_v62 = vrot.slane %v621_v60, 2  ;;  %v630_v63 = vadd.f32 %v629_v61, %v628_v59 }
 0x2fb   : > { %v623_v0 = vadd.f32 %v622_v62, %v621_v60  ;;  %v631_v2 = vrot.slane %v630_v63, 2 }
 0x2fd   : > { %v624_v3 = vrot.slane %v623_v0, 1  ;;  %v632_v4 = vadd.f32 %v631_v2, %v630_v63 }
 0x2ff   : > { %v625_v5 = vadd.f32 %v624_v3, %v623_v0  ;;  %v633_v6 = vrot.slane %v632_v4, 1 }
 0x301   : > { %v634_v7 = vadd.f32 %v633_v6, %v632_v4  ;;  %v635_v8 = vmul.f32 0.0625, %v625_v5 }
 0x303   : > { %v636_v9 = vmul.f32 0.0625, %v634_v7  ;;  %v637_v10 = vmul.f32 %v635_v8, %v635_v8  ;;  %v641_v11 = vsub.f32 %v618_v54, %v635_v8  ;;  %v640_v12 = vsub.f32 %v617_v52, %v635_v8 }
 0x305   : > { %v638_v13 = vsub.f32 %v636_v9, %v637_v10 }
 0x307   : > { %v639_v14 = vmax.f32 %v638_v13, 0.0 }
 0x309   : > { %v642_v15 = vadd.f32 1e-05, %v639_v14 }
 0x30b   : > { %2864 = vrsqrt.f32 %v642_v15 }
 0x315   : > { %v2865_v16 = vpop.eup %2864 }
 0x316   : > { %v645_v18 = vmul.f32 %v2865_v16, %v641_v11  ;;  %v644_v19 = vmul.f32 %v2865_v16, %v640_v12 }
 0x318   : > { %v650_v21 = vmul.f32 %v3170_v17, %v644_v19  ;;  %v651_v22 = vmul.f32 %v3170_v17, %v645_v18 }
 0x31a   : > { %v656_v24 = vadd.f32 %v3173_v20, %v650_v21  ;;  %v657_v25 = vadd.f32 %v3173_v20, %v651_v22 }
 0x31c   : > { %v658_v26 = vpack.c.bf16 %v657_v25, %v656_v24 }
 0x31e   : > { %2581 = vmatmul.mubr.bf16.vlgmr.msra.gmra.mrb[0].mxu1 %v658_v26 }
 0x31f   : > { %2606 = vmatprep.mubr.msk.bf16.mxu1 %vm2947_vm0, %v2946_v1  ;;  %2591 = vmatpush3.bf16.msra.mxu1 %v2814_v40 }
 0x320   : > { %2592 = vmatprep.subr.bf16.mxu1 %v2946_v1 }
 0x3f1   : > { %v758_v27 = vpop.f32.mrb[0].mxu1 }
 0x3f2   : > { %v2582_v28 = vpop.f32.mrb[1].mxu1 }
 0x3f3   : > { %v761_v30 = vpop.f32.mrb[2].mxu1 }
 0x3f4   : > { %v765_v32 = vpack.c.bf16 %v761_v30, %v758_v27  ;;  %v2583_v33 = vpop.f32.mrb[3].mxu1 }
 0x3f6   : > { %2584 = vmatprep.subr.bf16.mxu0 %v765_v32 }
 0x3f7   : > { %2585 = vmatpush3.bf16.msra.mxu0 %v765_v32 }
 0x3fa   : > { %2587 = vmatmul.mubr.msk.bf16.vlgmr.msra.gmra.mrb[8].mxu0 %vm546_vm1, %v3137_v29 }
 0x3fb   : > { %2612 = vmatprep.mubr.msk.bf16.mxu0 %vm546_vm1, %v3132_v23  ;;  %v2815_v23 = vld [vmem:[%s3070_s19 + $0x88] sm:$0xff]  }
 0x3fc   : > { %2593 = vmatpush3.bf16.msra.mxu1 %v2815_v23 }
 0x3fd   : > { %2594 = vmatprep.subr.bf16.mxu1 %v2946_v1 }
 0x400   : > { %2595 = vmatpush3.bf16.msra.mxu1 %v2816_v41 }
 0x401   : > { %2596 = vmatprep.subr.bf16.mxu1 %v2946_v1 }
 0x404   : > { %2597 = vmatpush3.bf16.msra.mxu1 %v2817_v42 }
 0x405   : > { %2598 = vmatprep.subr.bf16.mxu1 %v2946_v1 }
 0x408   : > { %2599 = vmatpush3.bf16.msra.mxu1 %v2818_v43 }
 0x409   : > { %2600 = vmatprep.subr.bf16.mxu1 %v2946_v1 }
 0x40c   : > { %2601 = vmatpush3.bf16.msra.mxu1 %v2819_v44  ;;  %v2308_v44 = vld [vmem:[%s3088_s15 + $0x10] sm:$0xff] }
 0x40d   : > { %2602 = vmatprep.subr.bf16.mxu1 %v2946_v1 }
 0x410   : > { %2603 = vmatpush3.bf16.msra.mxu1 %v2820_v45  ;;  %v2827_v45 = vld [vmem:[%s3070_s19 + $0xe8] sm:$0xff]  }
 0x411   : > { %2604 = vmatprep.subr.bf16.mxu1 %v2946_v1 }
 0x414   : > { %2605 = vmatpush3.bf16.msra.mxu1 %v2821_v46  ;;  %v2309_v46 = vld [vmem:[%s3088_s15 + $0x18] sm:$0xff] }
 0x415   : > { %2642 = vmatprep.subr.bf16.mxu1 %v2946_v1 }
 0x4cd   : > { %v2588_v34 = vpop.f32.mrb[8].mxu0 }
 0x4ce   : > { %v800_v35 = vpop.f32.mrb[9].mxu0 }
 0x4cf   : > { %v2589_v36 = vpop.f32.mrb[10].mxu0  ;;  %v815_v37 = vsel %vm394_vm2, %v800_v35, %v2588_v34  ;;  %v2822_v35 = vld [vmem:[%s3070_s19 + $0xc0] sm:$0xff]  }
 0x4d0   : > { %817 = vrot.lane.b32.xlu0 %v815_v37, %s2948_s14  ;;  %v803_v38 = vpop.f32.mrb[11].mxu0  ;;  %v2824_v37 = vld [vmem:[%s3070_s19 + $0xd0] sm:$0xff]  }
 0x4d1   : > { %v816_v39 = vsel %vm394_vm2, %v803_v38, %v2589_v36  ;;  %v2823_v36 = vld [vmem:[%s3070_s19 + $0xc8] sm:$0xff]   ;;  %v2825_v38 = vld [vmem:[%s3070_s19 + $0xd8] sm:$0xff]  }
 0x4d2   : > { %819 = vrot.lane.b32.xlu1 %v816_v39, %s2948_s14  ;;  %v2826_v39 = vld [vmem:[%s3070_s19 + $0xe0] sm:$0xff]  }
 0x542   : > { %v818_v48 = vpop.permute.xlu0 %817 }
 0x543   : > { %v821_v49 = vadd.f32 %v818_v48, %v758_v27  ;;  %v2829_v48 = vld [vmem:[%s3070_s19 + $0xf8] sm:$0xff]  }
 0x544   : > { %v820_v50 = vpop.permute.xlu1 %819 }
 0x545   : > { %v828_v51 = vadd.f32 %v2269_v47, %v821_v49  ;;  %v822_v52 = vadd.f32 %v820_v50, %v761_v30  ;;  %v2296_v49 = vld [vmem:[%s3127_s12 + $0x4] ss:$0 sm:$0xff] }
 0x547   : > { %v830_v53 = vmax.f32 %v828_v51, 0.0  ;;  %v829_v54 = vadd.f32 %v2269_v47, %v822_v52  ;;  %v2828_v47 = vld [vmem:[%s3070_s19 + $0xf0] sm:$0xff]  }
 0x549   : > { %v831_v55 = vmax.f32 %v829_v54, 0.0  ;;  %v839_v56 = vmul.f32 %v830_v53, %v830_v53 }
 0x54b   : > { %v832_v57 = vadd.f32 %v831_v55, %v830_v53  ;;  %v840_v58 = vmul.f32 %v831_v55, %v831_v55 }
 0x54d   : > { %v833_v59 = vrot.slane %v832_v57, 4  ;;  %v841_v60 = vadd.f32 %v840_v58, %v839_v56 }
 0x54f   : > { %v834_v61 = vadd.f32 %v833_v59, %v832_v57  ;;  %v842_v62 = vrot.slane %v841_v60, 4 }
 0x551   : > { %v835_v63 = vrot.slane %v834_v61, 2  ;;  %v843_v0 = vadd.f32 %v842_v62, %v841_v60 }
 0x553   : > { %v836_v2 = vadd.f32 %v835_v63, %v834_v61  ;;  %v844_v3 = vrot.slane %v843_v0, 2 }
 0x555   : > { %v837_v4 = vrot.slane %v836_v2, 1  ;;  %v845_v5 = vadd.f32 %v844_v3, %v843_v0 }
 0x557   : > { %v838_v6 = vadd.f32 %v837_v4, %v836_v2  ;;  %v846_v7 = vrot.slane %v845_v5, 1  ;;  %v2311_v4 = vld [vmem:[%s3127_s12 + $0x10] ss:$0 sm:$0xff] }
 0x559   : > { %v847_v8 = vadd.f32 %v846_v7, %v845_v5  ;;  %v848_v9 = vmul.f32 0.0625, %v838_v6  ;;  %v2313_v7 = vld [vmem:[%s3127_s12 + $0x11] ss:$0 sm:$0xff] }
 0x55b   : > { %v849_v10 = vmul.f32 0.0625, %v847_v8  ;;  %v850_v11 = vmul.f32 %v848_v9, %v848_v9  ;;  %v854_v12 = vsub.f32 %v831_v55, %v848_v9  ;;  %v853_v13 = vsub.f32 %v830_v53, %v848_v9 }
 0x55d   : > { %v851_v14 = vsub.f32 %v849_v10, %v850_v11 }
 0x55f   : > { %v852_v15 = vmax.f32 %v851_v14, 0.0 }
 0x561   : > { %v855_v16 = vadd.f32 1e-05, %v852_v15 }
 0x563   : > { %2866 = vrsqrt.f32 %v855_v16 }
 0x56d   : > { %v2867_v18 = vpop.eup %2866 }
 0x56e   : > { %v858_v19 = vmul.f32 %v2867_v18, %v854_v12  ;;  %v857_v21 = vmul.f32 %v2867_v18, %v853_v13 }
 0x570   : > { %v859_v22 = vmul.f32 %v3170_v17, %v857_v21  ;;  %v860_v24 = vmul.f32 %v3170_v17, %v858_v19 }
 0x572   : > { %v861_v25 = vadd.f32 %v3173_v20, %v859_v22  ;;  %v862_v26 = vadd.f32 %v3173_v20, %v860_v24 }
 0x574   : > { %v863_v27 = vpack.c.bf16 %v862_v26, %v861_v25 }
 0x576   : > { %2607 = vmatmul.mubr.bf16.vlgmr.msra.gmra.mrb[4].mxu1 %v863_v27 }
 0x577   : > { %2658 = vmatprep.mubr.msk.bf16.mxu1 %vm2947_vm0, %v2946_v1  ;;  %2643 = vmatpush3.bf16.msra.mxu1 %v2822_v35 }
 0x578   : > { %2644 = vmatprep.subr.bf16.mxu1 %v2946_v1 }
 0x57b   : > { %2645 = vmatpush3.bf16.msra.mxu1 %v2823_v36 }
 0x57c   : > { %2646 = vmatprep.subr.bf16.mxu1 %v2946_v1 }
 0x57f   : > { %2647 = vmatpush3.bf16.msra.mxu1 %v2824_v37 }
 0x580   : > { %2648 = vmatprep.subr.bf16.mxu1 %v2946_v1 }
 0x583   : > { %2649 = vmatpush3.bf16.msra.mxu1 %v2825_v38 }
 0x584   : > { %2650 = vmatprep.subr.bf16.mxu1 %v2946_v1 }
 0x587   : > { %2651 = vmatpush3.bf16.msra.mxu1 %v2826_v39 }
 0x588   : > { %2652 = vmatprep.subr.bf16.mxu1 %v2946_v1 }
 0x58b   : > { %2653 = vmatpush3.bf16.msra.mxu1 %v2827_v45  ;;  %v2835_v45 = vld [vmem:[%s3119_s8 + $0x28] sm:$0xff]  }
 0x58c   : > { %2654 = vmatprep.subr.bf16.mxu1 %v2946_v1 }
 0x58f   : > { %2655 = vmatpush3.bf16.msra.mxu1 %v2828_v47  ;;  %v2837_v47 = vld [vmem:[%s3119_s8 + $0x38] sm:$0xff]  }
 0x590   : > { %2656 = vmatprep.subr.bf16.mxu1 %v2946_v1 }
 0x593   : > { %2657 = vmatpush3.bf16.msra.mxu1 %v2829_v48 }
 0x594   : > { %2694 = vmatprep.subr.bf16.mxu1 %v2946_v1 }
 0x649   : > { %v963_v28 = vpop.f32.mrb[4].mxu1 }
 0x64a   : > { %v2608_v30 = vpop.f32.mrb[5].mxu1 }
 0x64b   : > { %v966_v32 = vpop.f32.mrb[6].mxu1 }
 0x64c   : > { %v970_v33 = vpack.c.bf16 %v966_v32, %v963_v28  ;;  %v2609_v34 = vpop.f32.mrb[7].mxu1 }
 0x64e   : > { %2610 = vmatprep.subr.bf16.mxu0 %v970_v33 }
 0x64f   : > { %2611 = vmatpush3.bf16.msra.mxu0 %v970_v33 }
 0x650   : > { %2616 = vmatprep.subr.bf16.mxu0 %v2946_v1 }
 0x652   : > { %2613 = vmatmul.mubr.msk.bf16.vlgmr.msra.gmra.mrb[12].mxu0 %vm546_vm1, %v3137_v29 }
 0x653   : > { %2618 = vmatprep.mubr.msk.bf16.mxu0 %vm2947_vm0, %v2946_v1 }
 0x725   : > { %v2614_v29 = vpop.f32.mrb[12].mxu0 }
 0x726   : > { %v1005_v40 = vpop.f32.mrb[13].mxu0 }
 0x727   : > { %v2615_v23 = vpop.f32.mrb[14].mxu0  ;;  %v1020_v41 = vsel %vm394_vm2, %v1005_v40, %v2614_v29 }
 0x728   : > { %1022 = vrot.lane.b32.xlu0 %v1020_v41, %s2948_s14  ;;  %v1008_v42 = vpop.f32.mrb[15].mxu0  ;;  %v1068_v41 = vld [vmem:[%s3256_s24] sm:$0x1] }
 0x729   : > { %v1021_v43 = vsel %vm394_vm2, %v1008_v42, %v2615_v23  ;;  %v2830_v42 = vld [vmem:[%s3119_s8] sm:$0xff]  }
 0x72a   : > { %1024 = vrot.lane.b32.xlu1 %v1021_v43, %s2948_s14  ;;  %v2833_v43 = vld [vmem:[%s3119_s8 + $0x18] sm:$0xff]  }
 0x72c   : > { %1241 = vperm.xlu0 %2794, %v2308_v44   ;;  %v2834_v44 = vld [vmem:[%s3119_s8 + $0x20] sm:$0xff]  }
 0x72e   : > { %1246 = vperm.xlu1 %2795, %v2309_v46   ;;  %v2836_v46 = vld [vmem:[%s3119_s8 + $0x30] sm:$0xff]  }
 0x79a   : > { %v1023_v50 = vpop.permute.xlu0 %1022 }
 0x79b   : > { %v1026_v51 = vadd.f32 %v1023_v50, %v963_v28 }
 0x79c   : > { %v1025_v52 = vpop.permute.xlu1 %1024 }
 0x79d   : > { %v1033_v53 = vadd.f32 %v2296_v49, %v1026_v51  ;;  %v1027_v54 = vadd.f32 %v1025_v52, %v966_v32 }
 0x79f   : > { %v1035_v55 = vmax.f32 %v1033_v53, 0.0  ;;  %v1034_v56 = vadd.f32 %v2296_v49, %v1027_v54  ;;  %v3279_v54 = vld [vmem:[%s3100_s21 + $0x10] sm:$0xff]  }
 0x7a1   : > { %v1036_v57 = vmax.f32 %v1034_v56, 0.0  ;;  %v1044_v58 = vmul.f32 %v1035_v55, %v1035_v55 }
 0x7a3   : > { %v1037_v59 = vadd.f32 %v1036_v57, %v1035_v55  ;;  %v1045_v60 = vmul.f32 %v1036_v57, %v1036_v57 }
 0x7a5   : > { %v1038_v61 = vrot.slane %v1037_v59, 4  ;;  %v1046_v62 = vadd.f32 %v1045_v60, %v1044_v58 }
 0x7a7   : > { %v1039_v63 = vadd.f32 %v1038_v61, %v1037_v59  ;;  %v1047_v0 = vrot.slane %v1046_v62, 4  ;;  %v3285_v59 = vld [vmem:[%s3100_s21 + $0x18] sm:$0xff]  }
 0x7a9   : > { %v1040_v2 = vrot.slane %v1039_v63, 2  ;;  %v1048_v3 = vadd.f32 %v1047_v0, %v1046_v62 }
 0x7ab   : > { %v1041_v5 = vadd.f32 %v1040_v2, %v1039_v63  ;;  %v1049_v6 = vrot.slane %v1048_v3, 2  ;;  %v1242_v8 = vpop.permute.xlu0 %1241 }
 0x7ac   : > { %v1253_v9 = vmul.f32 %v2311_v4, %v1242_v8  ;;  %v2841_v8 = vld [vmem:[%s3070_s19 + $0x108] sm:$0xff]  }
 0x7ad   : > { %v1042_v10 = vrot.slane %v1041_v5, 1  ;;  %v1050_v11 = vadd.f32 %v1049_v6, %v1048_v3  ;;  %v1247_v12 = vpop.permute.xlu1 %1246 }
 0x7ae   : > { %v1260_v13 = vadd.f32 %v2313_v7, %v1253_v9  ;;  %v1254_v14 = vmul.f32 %v2311_v4, %v1247_v12  ;;  %v2842_v9 = vld [vmem:[%s3070_s19 + $0x110] sm:$0xff]   ;;  %v2845_v12 = vld [vmem:[%s3070_s19 + $0x128] sm:$0xff]  }
 0x7af   : > { %v1043_v15 = vadd.f32 %v1042_v10, %v1041_v5  ;;  %v1051_v16 = vrot.slane %v1050_v11, 1  ;;  %v2843_v10 = vld [vmem:[%s3070_s19 + $0x118] sm:$0xff]  }
 0x7b0   : > { %v1261_v18 = vadd.f32 %v2313_v7, %v1254_v14  ;;  %v1262_v22 = vmax.f32 %v1260_v13, 0.0  ;;  %v2840_v7 = vld [vmem:[%s3070_s19 + $0x100] sm:$0xff]   ;;  %v2846_v13 = vld [vmem:[%s3070_s19 + $0x130] sm:$0xff]   ;;  %v2847_v14 = vld [vmem:[%s3070_s19 + $0x138] sm:$0xff]  }
 0x7b1   : > { %v1052_v19 = vadd.f32 %v1051_v16, %v1050_v11  ;;  %v1053_v21 = vmul.f32 0.0625, %v1043_v15  ;;  %v2844_v11 = vld [vmem:[%s3070_s19 + $0x120] sm:$0xff]   ;;  %v2349_v15 = vld [vmem:[%s3127_s12 + $0x12] ss:$0 sm:$0xff] }
 0x7b2   : > { %v1263_v24 = vmax.f32 %v1261_v18, 0.0 }
 0x7b3   : > { %v1054_v25 = vmul.f32 0.0625, %v1052_v19  ;;  %v1055_v26 = vmul.f32 %v1053_v21, %v1053_v21  ;;  %v1059_v27 = vsub.f32 %v1036_v57, %v1053_v21  ;;  %v1058_v28 = vsub.f32 %v1035_v55, %v1053_v21 }
 0x7b4   : > { %v1271_v30 = vpack.c.bf16 %v1263_v24, %v1262_v22 }
 0x7b5   : > { %v1056_v32 = vsub.f32 %v1054_v25, %v1055_v26 }
 0x7b6   : > { %2659 = vmatmul.mubr.bf16.vlgmr.msra.gmra.mrb[8].mxu1 %v1271_v30 }
 0x7b7   : > { %v1057_v33 = vmax.f32 %v1056_v32, 0.0  ;;  %2710 = vmatprep.mubr.msk.bf16.mxu1 %vm2947_vm0, %v2946_v1 }
 0x7b9   : > { %v1060_v34 = vadd.f32 1e-05, %v1057_v33 }
 0x7bb   : > { %2868 = vrsqrt.f32 %v1060_v34 }
 0x7c5   : > { %v2869_v35 = vpop.eup %2868 }
 0x7c6   : > { %v1063_v36 = vmul.f32 %v2869_v35, %v1059_v27  ;;  %v1062_v37 = vmul.f32 %v2869_v35, %v1058_v28 }
 0x7c8   : > { %v1064_v38 = vmul.f32 %v3170_v17, %v1062_v37  ;;  %v1065_v29 = vmul.f32 %v3170_v17, %v1063_v36  ;;  %v2831_v17 = vld [vmem:[%s3119_s8 + $0x8] sm:$0xff]  }
 0x7ca   : > { %v1066_v39 = vadd.f32 %v3173_v20, %v1064_v38  ;;  %v1067_v40 = vadd.f32 %v3173_v20, %v1065_v29  ;;  %v2832_v20 = vld [vmem:[%s3119_s8 + $0x10] sm:$0xff]  }
 0x7cc   : > { %v1069_v23 = vpack.c.bf16 %v1067_v40, %v1066_v39 }
 0x7ce   : > { %2617 = vmatpush3.bf16.msra.mxu0 %v1069_v23 }
 0x7cf   : > { %2622 = vmatprep.subr.bf16.mxu0 %v2946_v1 }
 0x7d1   : > { %2619 = vmatmul.mubr.msk.bf16.vlgmr.msra.gmra.mrb[16].mxu0 %vm546_vm1, %v1068_v41 }
 0x7d2   : > { %2623 = vmatpush3.bf16.msra.mxu0 %v2830_v42  ;;  %2638 = vmatprep.mubr.msk.bf16.mxu0 %vm2947_vm0, %v2946_v1 }
 0x7d3   : > { %2624 = vmatprep.subr.bf16.mxu0 %v2946_v1 }
 0x7d6   : > { %2625 = vmatpush3.bf16.msra.mxu0 %v2831_v17 }
 0x7d7   : > { %2626 = vmatprep.subr.bf16.mxu0 %v2946_v1 }
 0x7da   : > { %2627 = vmatpush3.bf16.msra.mxu0 %v2832_v20 }
 0x7db   : > { %2628 = vmatprep.subr.bf16.mxu0 %v2946_v1 }
 0x7de   : > { %2629 = vmatpush3.bf16.msra.mxu0 %v2833_v43 }
 0x7df   : > { %2630 = vmatprep.subr.bf16.mxu0 %v2946_v1 }
 0x7e2   : > { %2631 = vmatpush3.bf16.msra.mxu0 %v2834_v44 }
 0x7e3   : > { %2632 = vmatprep.subr.bf16.mxu0 %v2946_v1 }
 0x7e6   : > { %2633 = vmatpush3.bf16.msra.mxu0 %v2835_v45 }
 0x7e7   : > { %2634 = vmatprep.subr.bf16.mxu0 %v2946_v1 }
 0x7ea   : > { %2635 = vmatpush3.bf16.msra.mxu0 %v2836_v46 }
 0x7eb   : > { %2636 = vmatprep.subr.bf16.mxu0 %v2946_v1 }
 0x7ee   : > { %2637 = vmatpush3.bf16.msra.mxu0 %v2837_v47 }
 0x889   : > { %v1371_v48 = vpop.f32.mrb[8].mxu1 }
 0x88a   : > { %v2660_v49 = vpop.f32.mrb[9].mxu1 }
 0x88b   : > { %v1374_v50 = vpop.f32.mrb[10].mxu1 }
 0x88c   : > { %v1378_v51 = vpack.c.bf16 %v1374_v50, %v1371_v48  ;;  %v2661_v52 = vpop.f32.mrb[11].mxu1 }
 0x88e   : > { %2662 = vmatprep.subr.bf16.mxu0 %v1378_v51 }
 0x8a4   : > { %v1107_v53 = vpop.f32.mrb[16].mxu0 }
 0x8a5   : > { %v1113_v55 = vpack.c.bf16 %v1107_v53, %v1107_v53  ;;  %v2620_v56 = vpop.f32.mrb[17].mxu0  ;;  %v3319_v53 = vld [vmem:[%s3127_s12 + $0x16] ss:$0 sm:$0xff] }
 0x8a6   : > { %v1110_v57 = vpop.f32.mrb[18].mxu0 }
 0x8a7   : > { %v2621_v58 = vpop.f32.mrb[19].mxu0  ;;  %2639 = vmatmul.mubr.bf16.vlgmr.msra.gmra.mrb[20].mxu0 %v1113_v55 }
 0x8a8   : > { %2663 = vmatpush3.bf16.msra.mxu0 %v1378_v51  ;;  %2664 = vmatprep.mubr.msk.bf16.mxu0 %vm546_vm1, %v3279_v54 }
 0x8a9   : > { %2668 = vmatprep.subr.bf16.mxu0 %v2946_v1 }
 0x8af   : > { %2665 = vmatmul.mubr.msk.bf16.vlgmr.msra.gmra.mrb[24].mxu0 %vm546_vm1, %v3285_v59 }
 0x8b0   : > { %2684 = vmatprep.mubr.msk.bf16.mxu0 %vm2947_vm0, %v2946_v1  ;;  %2669 = vmatpush3.bf16.msra.mxu0 %v2840_v7 }
 0x8b1   : > { %2670 = vmatprep.subr.bf16.mxu0 %v2946_v1 }
 0x8b4   : > { %2671 = vmatpush3.bf16.msra.mxu0 %v2841_v8 }
 0x8b5   : > { %2672 = vmatprep.subr.bf16.mxu0 %v2946_v1 }
 0x8b8   : > { %2673 = vmatpush3.bf16.msra.mxu0 %v2842_v9 }
 0x8b9   : > { %2674 = vmatprep.subr.bf16.mxu0 %v2946_v1 }
 0x8bc   : > { %2675 = vmatpush3.bf16.msra.mxu0 %v2843_v10  ;;  %v2848_v10 = vld [vmem:[%s3070_s19 + $0x140] sm:$0xff]  }
 0x8bd   : > { %2676 = vmatprep.subr.bf16.mxu0 %v2946_v1  ;;  %2695 = vmatpush3.bf16.msra.mxu1 %v2848_v10 }
 0x8be   : > { %2696 = vmatprep.subr.bf16.mxu1 %v2946_v1 }
 0x8c0   : > { %2677 = vmatpush3.bf16.msra.mxu0 %v2844_v11  ;;  %v2850_v11 = vld [vmem:[%s3070_s19 + $0x150] sm:$0xff]  }
 0x8c1   : > { %2678 = vmatprep.subr.bf16.mxu0 %v2946_v1 }
 0x8c4   : > { %2679 = vmatpush3.bf16.msra.mxu0 %v2845_v12  ;;  %v2851_v12 = vld [vmem:[%s3070_s19 + $0x158] sm:$0xff]  }
 0x8c5   : > { %2680 = vmatprep.subr.bf16.mxu0 %v2946_v1 }
 0x8c8   : > { %2681 = vmatpush3.bf16.msra.mxu0 %v2846_v13  ;;  %v2852_v13 = vld [vmem:[%s3070_s19 + $0x160] sm:$0xff]  }
 0x8c9   : > { %2682 = vmatprep.subr.bf16.mxu0 %v2946_v1 }
 0x8cc   : > { %2683 = vmatpush3.bf16.msra.mxu0 %v2847_v14  ;;  %v2853_v14 = vld [vmem:[%s3070_s19 + $0x168] sm:$0xff]  }
 0x97a   : > { %v3291_v60 = vpop.f32.mrb[20].mxu0 }
 0x97b   : > { %v2640_v61 = vpop.f32.mrb[21].mxu0 }
 0x97c   : > { %v1220_v62 = vpop.f32.mrb[22].mxu0 }
 0x97d   : > { %v2641_v63 = vpop.f32.mrb[23].mxu0 }
 0x982   : > { %v2666_v0 = vpop.f32.mrb[24].mxu0 }
 0x983   : > { %v1429_v2 = vpop.f32.mrb[25].mxu0 }
 0x984   : > { %v2667_v3 = vpop.f32.mrb[26].mxu0  ;;  %v1444_v4 = vsel %vm394_vm2, %v1429_v2, %v2666_v0 }
 0x985   : > { %1446 = vrot.lane.b32.xlu0 %v1444_v4, %s2948_s14  ;;  %v1432_v5 = vpop.f32.mrb[27].mxu0 }
 0x986   : > { %v1445_v6 = vsel %vm394_vm2, %v1432_v5, %v2667_v3 }
 0x987   : > { %1448 = vrot.lane.b32.xlu1 %v1445_v6, %s2948_s14 }
 0x9f7   : > { %v1447_v16 = vpop.permute.xlu0 %1446 }
 0x9f8   : > { %v1450_v18 = vadd.f32 %v1447_v16, %v1371_v48  ;;  %v2855_v16 = vld [vmem:[%s3070_s19 + $0x178] sm:$0xff]  }
 0x9f9   : > { %v1449_v19 = vpop.permute.xlu1 %1448 }
 0x9fa   : > { %v1457_v21 = vadd.f32 %v2349_v15, %v1450_v18  ;;  %v1451_v22 = vadd.f32 %v1449_v19, %v1374_v50  ;;  %v3316_v50 = vld [vmem:[%s3127_s12 + $0x15] ss:$0 sm:$0xff]  ;;  %v2379_v18 = vld [vmem:[%s3127_s12 + $0x13] ss:$0 sm:$0xff] }
 0x9fc   : > { %v1459_v24 = vmax.f32 %v1457_v21, 0.0  ;;  %v1458_v25 = vadd.f32 %v2349_v15, %v1451_v22  ;;  %v2854_v15 = vld [vmem:[%s3070_s19 + $0x170] sm:$0xff]  }
 0x9fe   : > { %v1460_v26 = vmax.f32 %v1458_v25, 0.0  ;;  %v1468_v27 = vmul.f32 %v1459_v24, %v1459_v24 }
 0xa00   : > { %v1461_v28 = vadd.f32 %v1460_v26, %v1459_v24  ;;  %v1469_v30 = vmul.f32 %v1460_v26, %v1460_v26 }
 0xa02   : > { %v1462_v32 = vrot.slane %v1461_v28, 4  ;;  %v1470_v33 = vadd.f32 %v1469_v30, %v1468_v27 }
 0xa04   : > { %v1463_v34 = vadd.f32 %v1462_v32, %v1461_v28  ;;  %v1471_v35 = vrot.slane %v1470_v33, 4 }
 0xa06   : > { %v1464_v36 = vrot.slane %v1463_v34, 2  ;;  %v1472_v37 = vadd.f32 %v1471_v35, %v1470_v33 }
 0xa08   : > { %v1465_v38 = vadd.f32 %v1464_v36, %v1463_v34  ;;  %v1473_v29 = vrot.slane %v1472_v37, 2 }
 0xa0a   : > { %v1466_v39 = vrot.slane %v1465_v38, 1  ;;  %v1474_v40 = vadd.f32 %v1473_v29, %v1472_v37 }
 0xa0c   : > { %v1467_v23 = vadd.f32 %v1466_v39, %v1465_v38  ;;  %v1475_v41 = vrot.slane %v1474_v40, 1 }
 0xa0e   : > { %v1476_v42 = vadd.f32 %v1475_v41, %v1474_v40  ;;  %v1477_v17 = vmul.f32 0.0625, %v1467_v23 }
 0xa10   : > { %v1478_v20 = vmul.f32 0.0625, %v1476_v42  ;;  %v1479_v43 = vmul.f32 %v1477_v17, %v1477_v17  ;;  %v1483_v44 = vsub.f32 %v1460_v26, %v1477_v17  ;;  %v1482_v45 = vsub.f32 %v1459_v24, %v1477_v17 }
 0xa12   : > { %v1480_v46 = vsub.f32 %v1478_v20, %v1479_v43 }
 0xa14   : > { %v1481_v47 = vmax.f32 %v1480_v46, 0.0 }
 0xa16   : > { %v1484_v48 = vadd.f32 1e-05, %v1481_v47 }
 0xa18   : > { %2870 = vrsqrt.f32 %v1484_v48 }
 0xa22   : > { %v2871_v49 = vpop.eup %2870 }
 0xa23   : > { %v1487_v51 = vmul.f32 %v2871_v49, %v1483_v44  ;;  %v1486_v52 = vmul.f32 %v2871_v49, %v1482_v45 }
 0xa25   : > { %v1492_v55 = vmul.f32 %v3316_v50, %v1486_v52  ;;  %v1493_v56 = vmul.f32 %v3316_v50, %v1487_v51 }
 0xa27   : > { %v1498_v57 = vadd.f32 %v3319_v53, %v1492_v55  ;;  %v1499_v58 = vadd.f32 %v3319_v53, %v1493_v56 }
 0xa29   : > { %v1500_v61 = vpack.c.bf16 %v1499_v58, %v1498_v57 }
 0xa2b   : > { %2685 = vmatmul.mubr.bf16.vlgmr.msra.gmra.mrb[28].mxu0 %v1500_v61 }
 0xa2c   : > { %2690 = vmatprep.mubr.msk.bf16.mxu0 %vm546_vm1, %v3279_v54 }
 0xafe   : > { %v1600_v62 = vpop.f32.mrb[28].mxu0 }
 0xaff   : > { %v2686_v63 = vpop.f32.mrb[29].mxu0 }
 0xb00   : > { %v1603_v0 = vpop.f32.mrb[30].mxu0 }
 0xb01   : > { %v1607_v2 = vpack.c.bf16 %v1603_v0, %v1600_v62  ;;  %v2687_v3 = vpop.f32.mrb[31].mxu0 }
 0xb03   : > { %2688 = vmatprep.subr.bf16.mxu0 %v1607_v2 }
 0xb04   : > { %2689 = vmatpush3.bf16.msra.mxu0 %v1607_v2 }
 0xb07   : > { %2691 = vmatmul.mubr.msk.bf16.vlgmr.msra.gmra.mrb[32].mxu0 %vm546_vm1, %v3285_v59 }
 0xb08   : > { %2716 = vmatprep.mubr.msk.bf16.mxu0 %vm546_vm1, %v3279_v54  ;;  %v2849_v54 = vld [vmem:[%s3070_s19 + $0x148] sm:$0xff]   ;;  %s2225_s19 = sshll.u32 %s3436_s25, 2 }
 0xb09   : > { %2697 = vmatpush3.bf16.msra.mxu1 %v2849_v54  ;;  %s390_s13 = scalar_lea.vmem %s3425_s6, %s2225_s19 }
 0xb0a   : > { %2698 = vmatprep.subr.bf16.mxu1 %v2946_v1 }
 0xb0d   : > { %2699 = vmatpush3.bf16.msra.mxu1 %v2850_v11 }
 0xb0e   : > { %2700 = vmatprep.subr.bf16.mxu1 %v2946_v1 }
 0xb11   : > { %2701 = vmatpush3.bf16.msra.mxu1 %v2851_v12 }
 0xb12   : > { %2702 = vmatprep.subr.bf16.mxu1 %v2946_v1 }
 0xb15   : > { %2703 = vmatpush3.bf16.msra.mxu1 %v2852_v13  ;;  %v2307_v13 = vld [vmem:[%s3127_s12 + $0x8] ss:$0 sm:$0xff] }
 0xb16   : > { %2704 = vmatprep.subr.bf16.mxu1 %v2946_v1 }
 0xb19   : > { %2705 = vmatpush3.bf16.msra.mxu1 %v2853_v14 }
 0xb1a   : > { %2706 = vmatprep.subr.bf16.mxu1 %v2946_v1 }
 0xb1d   : > { %2707 = vmatpush3.bf16.msra.mxu1 %v2854_v15 }
 0xb1e   : > { %2708 = vmatprep.subr.bf16.mxu1 %v2946_v1 }
 0xb21   : > { %2709 = vmatpush3.bf16.msra.mxu1 %v2855_v16  ;;  %v2856_v16 = vld [vmem:[%s3119_s8 + $0x40] sm:$0xff]  }
 0xb22   : > { %2726 = vmatprep.subr.bf16.mxu1 %v2946_v1 }
 0xbda   : > { %v2692_v4 = vpop.f32.mrb[32].mxu0 }
 0xbdb   : > { %v1642_v5 = vpop.f32.mrb[33].mxu0 }
 0xbdc   : > { %v2693_v6 = vpop.f32.mrb[34].mxu0  ;;  %v1657_v7 = vsel %vm394_vm2, %v1642_v5, %v2692_v4 }
 0xbdd   : > { %1659 = vrot.lane.b32.xlu0 %v1657_v7, %s2948_s14  ;;  %v1645_v8 = vpop.f32.mrb[35].mxu0 }
 0xbde   : > { %v1658_v9 = vsel %vm394_vm2, %v1645_v8, %v2693_v6 }
 0xbdf   : > { %1661 = vrot.lane.b32.xlu1 %v1658_v9, %s2948_s14 }
 0xc4f   : > { %v1660_v19 = vpop.permute.xlu0 %1659 }
 0xc50   : > { %v1663_v21 = vadd.f32 %v1660_v19, %v1600_v62  ;;  %v2860_v19 = vld [vmem:[%s3119_s8 + $0x60] sm:$0xff]  }
 0xc51   : > { %v1662_v22 = vpop.permute.xlu1 %1661 }
 0xc52   : > { %v1670_v24 = vadd.f32 %v2379_v18, %v1663_v21  ;;  %v1664_v25 = vadd.f32 %v1662_v22, %v1603_v0  ;;  %v2861_v21 = vld [vmem:[%s3119_s8 + $0x68] sm:$0xff]   ;;  %v2862_v22 = vld [vmem:[%s3119_s8 + $0x70] sm:$0xff]  }
 0xc54   : > { %v1672_v26 = vmax.f32 %v1670_v24, 0.0  ;;  %v1671_v27 = vadd.f32 %v2379_v18, %v1664_v25  ;;  %v2858_v18 = vld [vmem:[%s3119_s8 + $0x50] sm:$0xff]  }
 0xc55   : > { %v2407_v24 = vld [vmem:[%s3127_s12 + $0x14] ss:$0 sm:$0xff] }
 0xc56   : > { %v1673_v28 = vmax.f32 %v1671_v27, 0.0  ;;  %v1681_v30 = vmul.f32 %v1672_v26, %v1672_v26 }
 0xc58   : > { %v1674_v32 = vadd.f32 %v1673_v28, %v1672_v26  ;;  %v1682_v33 = vmul.f32 %v1673_v28, %v1673_v28 }
 0xc5a   : > { %v1675_v34 = vrot.slane %v1674_v32, 4  ;;  %v1683_v35 = vadd.f32 %v1682_v33, %v1681_v30 }
 0xc5c   : > { %v1676_v36 = vadd.f32 %v1675_v34, %v1674_v32  ;;  %v1684_v37 = vrot.slane %v1683_v35, 4 }
 0xc5e   : > { %v1677_v38 = vrot.slane %v1676_v36, 2  ;;  %v1685_v29 = vadd.f32 %v1684_v37, %v1683_v35 }
 0xc60   : > { %v1678_v39 = vadd.f32 %v1677_v38, %v1676_v36  ;;  %v1686_v40 = vrot.slane %v1685_v29, 2 }
 0xc62   : > { %v1679_v23 = vrot.slane %v1678_v39, 1  ;;  %v1687_v41 = vadd.f32 %v1686_v40, %v1685_v29 }
 0xc64   : > { %v1680_v42 = vadd.f32 %v1679_v23, %v1678_v39  ;;  %v1688_v17 = vrot.slane %v1687_v41, 1 }
 0xc66   : > { %v1689_v20 = vadd.f32 %v1688_v17, %v1687_v41  ;;  %v1690_v43 = vmul.f32 0.0625, %v1680_v42 }
 0xc68   : > { %v1691_v44 = vmul.f32 0.0625, %v1689_v20  ;;  %v1692_v45 = vmul.f32 %v1690_v43, %v1690_v43  ;;  %v1696_v46 = vsub.f32 %v1673_v28, %v1690_v43  ;;  %v1695_v47 = vsub.f32 %v1672_v26, %v1690_v43 }
 0xc6a   : > { %v1693_v48 = vsub.f32 %v1691_v44, %v1692_v45 }
 0xc6c   : > { %v1694_v49 = vmax.f32 %v1693_v48, 0.0 }
 0xc6e   : > { %v1697_v51 = vadd.f32 1e-05, %v1694_v49 }
 0xc70   : > { %2872 = vrsqrt.f32 %v1697_v51 }
 0xc7a   : > { %v2873_v52 = vpop.eup %2872 }
 0xc7b   : > { %v1700_v55 = vmul.f32 %v2873_v52, %v1696_v46  ;;  %v1699_v56 = vmul.f32 %v2873_v52, %v1695_v47 }
 0xc7d   : > { %v1701_v57 = vmul.f32 %v3316_v50, %v1699_v56  ;;  %v1702_v58 = vmul.f32 %v3316_v50, %v1700_v55 }
 0xc7f   : > { %v1703_v61 = vadd.f32 %v3319_v53, %v1701_v57  ;;  %v1704_v62 = vadd.f32 %v3319_v53, %v1702_v58 }
 0xc81   : > { %v1705_v63 = vpack.c.bf16 %v1704_v62, %v1703_v61 }
 0xc83   : > { %2711 = vmatmul.mubr.bf16.vlgmr.msra.gmra.mrb[12].mxu1 %v1705_v63 }
 0xc84   : > { %2742 = vmatprep.mubr.msk.bf16.mxu1 %vm2947_vm0, %v2946_v1  ;;  %2727 = vmatpush3.bf16.msra.mxu1 %v2856_v16 }
 0xc85   : > { %2728 = vmatprep.subr.bf16.mxu1 %v2946_v1 }
 0xc88   : > { %2729 = vmatpush3.bf16.msra.mxu1 %v2857_v31 }
 0xc89   : > { %2730 = vmatprep.subr.bf16.mxu1 %v2946_v1 }
 0xc8c   : > { %2731 = vmatpush3.bf16.msra.mxu1 %v2858_v18 }
 0xc8d   : > { %2732 = vmatprep.subr.bf16.mxu1 %v2946_v1 }
 0xd56   : > { %v1805_v0 = vpop.f32.mrb[12].mxu1 }
 0xd57   : > { %v2712_v2 = vpop.f32.mrb[13].mxu1 }
 0xd58   : > { %v1808_v3 = vpop.f32.mrb[14].mxu1 }
 0xd59   : > { %v1812_v4 = vpack.c.bf16 %v1808_v3, %v1805_v0  ;;  %v2713_v5 = vpop.f32.mrb[15].mxu1 }
 0xd5a   : > { %v2863_v5 = vld [vmem:[%s3119_s8 + $0x78] sm:$0xff]  }
 0xd5b   : > { %2714 = vmatprep.subr.bf16.mxu0 %v1812_v4 }
 0xd5c   : > { %2715 = vmatpush3.bf16.msra.mxu0 %v1812_v4  ;;  %v2408_v4 = vld [vmem:[%s3256_s24 + $0x1] sm:$0x1] }
 0xd5d   : > { %2720 = vmatprep.subr.bf16.mxu0 %v2946_v1 }
 0xd5f   : > { %2717 = vmatmul.mubr.msk.bf16.vlgmr.msra.gmra.mrb[36].mxu0 %vm546_vm1, %v3285_v59  ;;  %v2298_v59 = vld [vmem:[%s3127_s12 + $0x7] ss:$0 sm:$0xff] }
 0xd60   : > { %2722 = vmatprep.mubr.msk.bf16.mxu0 %vm2947_vm0, %v2946_v1  ;;  %v1218_v11 = vadd.f32 %v2298_v59, %v3291_v60  ;;  %v2859_v60 = vld [vmem:[%s3119_s8 + $0x58] sm:$0xff]  }
 0xd61   : > { %2733 = vmatpush3.bf16.msra.mxu1 %v2859_v60 }
 0xd62   : > { %v1223_v12 = vmax.f32 %v1218_v11, 0.0  ;;  %2734 = vmatprep.subr.bf16.mxu1 %v2946_v1 }
 0xd64   : > { %v1229_v14 = vmul.f32 %v2307_v13, %v1223_v12  ;;  %v2437_v12 = vld [vmem:[%s3127_s12 + $0x18] ss:$0 sm:$0xff] }
 0xd65   : > { %2735 = vmatpush3.bf16.msra.mxu1 %v2860_v19 }
 0xd66   : > { %v1231_v15 = vsel %vm1230_vm3, %v1229_v14, 0.0  ;;  %2736 = vmatprep.subr.bf16.mxu1 %v2946_v1 }
 0xd69   : > { %2737 = vmatpush3.bf16.msra.mxu1 %v2861_v21 }
 0xd6a   : > { %2738 = vmatprep.subr.bf16.mxu1 %v2946_v1 }
 0xd6d   : > { %2739 = vmatpush3.bf16.msra.mxu1 %v2862_v22 }
 0xd6e   : > { %2740 = vmatprep.subr.bf16.mxu1 %v2946_v1 }
 0xd71   : > { %2741 = vmatpush3.bf16.msra.mxu1 %v2863_v5 }
 0xe32   : > { %v2718_v6 = vpop.f32.mrb[36].mxu0 }
 0xe33   : > { %v1847_v7 = vpop.f32.mrb[37].mxu0 }
 0xe34   : > { %v2719_v8 = vpop.f32.mrb[38].mxu0  ;;  %v1862_v9 = vsel %vm394_vm2, %v1847_v7, %v2718_v6 }
 0xe35   : > { %1864 = vrot.lane.b32.xlu0 %v1862_v9, %s2948_s14  ;;  %v1850_v10 = vpop.f32.mrb[39].mxu0 }
 0xe36   : > { %v1863_v54 = vsel %vm394_vm2, %v1850_v10, %v2719_v8  ;;  %v2427_v10 = vld [vmem:[%s3127_s12 + $0x17] ss:$0 sm:$0xff] }
 0xe37   : > { %1866 = vrot.lane.b32.xlu1 %v1863_v54, %s2948_s14 }
 0xe5b   : > { %1232 = vadd.xlane.f32.xlu1 %v1231_v15 }
 0xea7   : > { %v1865_v25 = vpop.permute.xlu0 %1864 }
 0xea8   : > { %v1868_v26 = vadd.f32 %v1865_v25, %v1805_v0 }
 0xea9   : > { %v1867_v27 = vpop.permute.xlu1 %1866 }
 0xeaa   : > { %v1875_v28 = vadd.f32 %v2407_v24, %v1868_v26  ;;  %v1869_v30 = vadd.f32 %v1867_v27, %v1808_v3 }
 0xeac   : > { %v1877_v32 = vmax.f32 %v1875_v28, 0.0  ;;  %v1876_v33 = vadd.f32 %v2407_v24, %v1869_v30 }
 0xeae   : > { %v1878_v34 = vmax.f32 %v1876_v33, 0.0  ;;  %v1886_v35 = vmul.f32 %v1877_v32, %v1877_v32 }
 0xeb0   : > { %v1879_v36 = vadd.f32 %v1878_v34, %v1877_v32  ;;  %v1887_v37 = vmul.f32 %v1878_v34, %v1878_v34 }
 0xeb2   : > { %v1880_v38 = vrot.slane %v1879_v36, 4  ;;  %v1888_v29 = vadd.f32 %v1887_v37, %v1886_v35 }
 0xeb4   : > { %v1881_v39 = vadd.f32 %v1880_v38, %v1879_v36  ;;  %v1889_v40 = vrot.slane %v1888_v29, 4 }
 0xeb6   : > { %v1882_v23 = vrot.slane %v1881_v39, 2  ;;  %v1890_v41 = vadd.f32 %v1889_v40, %v1888_v29 }
 0xeb8   : > { %v1883_v42 = vadd.f32 %v1882_v23, %v1881_v39  ;;  %v1891_v1 = vrot.slane %v1890_v41, 2 }
 0xeba   : > { %v1884_v17 = vrot.slane %v1883_v42, 1  ;;  %v1892_v20 = vadd.f32 %v1891_v1, %v1890_v41 }
 0xebc   : > { %v1885_v43 = vadd.f32 %v1884_v17, %v1883_v42  ;;  %v1893_v44 = vrot.slane %v1892_v20, 1 }
 0xebe   : > { %v1894_v45 = vadd.f32 %v1893_v44, %v1892_v20  ;;  %v1895_v46 = vmul.f32 0.0625, %v1885_v43 }
 0xec0   : > { %v1896_v47 = vmul.f32 0.0625, %v1894_v45  ;;  %v1897_v48 = vmul.f32 %v1895_v46, %v1895_v46  ;;  %v1901_v49 = vsub.f32 %v1878_v34, %v1895_v46  ;;  %v1900_v51 = vsub.f32 %v1877_v32, %v1895_v46 }
 0xec2   : > { %v1898_v52 = vsub.f32 %v1896_v47, %v1897_v48 }
 0xec4   : > { %v1899_v55 = vmax.f32 %v1898_v52, 0.0 }
 0xec6   : > { %v1902_v56 = vadd.f32 1e-05, %v1899_v55 }
 0xec8   : > { %2874 = vrsqrt.f32 %v1902_v56 }
 0xed2   : > { %v2875_v57 = vpop.eup %2874 }
 0xed3   : > { %v1905_v58 = vmul.f32 %v2875_v57, %v1901_v49  ;;  %v1904_v61 = vmul.f32 %v2875_v57, %v1900_v51 }
 0xed5   : > { %v1906_v62 = vmul.f32 %v3316_v50, %v1904_v61  ;;  %v1907_v63 = vmul.f32 %v3316_v50, %v1905_v58 }
 0xed7   : > { %v1908_v0 = vadd.f32 %v3319_v53, %v1906_v62  ;;  %v1909_v2 = vadd.f32 %v3319_v53, %v1907_v63 }
 0xed9   : > { %v1912_v3 = vpack.c.bf16 %v1909_v2, %v1908_v0 }
 0xedb   : > { %2721 = vmatpush3.bf16.msra.mxu0 %v1912_v3 }
 0xede   : > { %2723 = vmatmul.mubr.msk.bf16.vlgmr.msra.gmra.mrb[40].mxu0 %vm546_vm1, %v2408_v4 }
 0xee8   : > { %v1233_v60 = vpop.xlane.xlu1 %1232 }
 0xfb1   : > { %v1950_v6 = vpop.f32.mrb[40].mxu0 }
 0xfb2   : > { %v1956_v7 = vpack.c.bf16 %v1950_v6, %v1950_v6  ;;  %v2724_v8 = vpop.f32.mrb[41].mxu0 }
 0xfb3   : > { %v1953_v9 = vpop.f32.mrb[42].mxu0 }
 0xfb4   : > { %2743 = vmatmul.mubr.bf16.vlgmr.msra.gmra.mrb[16].mxu1 %v1956_v7  ;;  %v2725_v50 = vpop.f32.mrb[43].mxu0 }
0x1087   : > { %v2061_v54 = vpop.f32.mrb[16].mxu1 }
0x1088   : > { %v2062_v59 = vadd.f32 %v2427_v10, %v2061_v54  ;;  %v2744_v53 = vpop.f32.mrb[17].mxu1 }
0x1089   : > { %v2064_v11 = vpop.f32.mrb[18].mxu1 }
0x108a   : > { %v2067_v13 = vmax.f32 %v2062_v59, 0.0  ;;  %v2745_v14 = vpop.f32.mrb[19].mxu1 }
0x108c   : > { %v2073_v15 = vmul.f32 %v2437_v12, %v2067_v13 }
0x108e   : > { %v2074_v16 = vsel %vm1230_vm3, %v2073_v15, 0.0 }
0x108f   : > { %2075 = vadd.xlane.f32.xlu0 %v2074_v16 }
0x111c   : > { %v2076_v31 = vpop.xlane.xlu0 %2075 }
0x111d   : > { %v2078_v18 = vrot.slane %v2076_v31, 6 }
0x111f   : > { %v2080_v19 = vsel %vm1230_vm3, %v1233_v60, %v2078_v18 }
0x1120   : > { %2082 = vst.msk [vmem:[%s390_s13] sm:$0xf] %vm2081_vm4, %v2080_v19 }
0x1121 PF: > { %p16_p9 = scmp.ge.s32.totalorder %s3006_s26, 4   ;;  %s3429_s21 = smov %s2932_s22 }
0x1122   : > { %s3430_s22 = smov %s2936_s23  ;;  %s3431_s23 = smov %s3016_s29 }
0x1123   : > { %s3432_s24 = smov %s3006_s26  ;;  %18 = sbr.rel (!%p16_p9) target bundleno = 3 (0x3), region = 109 }
0x112a   :  { %2102 = vsyncpa [#allocation3], 1 }
0x112b   :  { %2104 = vsyncpa [#allocation3 + $0x1], 1 }

</bundles_post_ra>
